<compile_context>
chip_gen: v7x
topology: tpu7x:2x2x1
jax: 0.10.0
libtpu: 0.0.40
codegen_flags: <defaults>
</compile_context>

<pallas_src>
import functools

import jax
import jax.numpy as jnp
from jax.experimental import pallas as pl
from jax.experimental.pallas import tpu as pltpu


def _cdiv(a, b):
    return -(-a // b)


def _round_up(x, m):
    return ((x + m - 1) // m) * m


def _num_tensorcores():
    """Best-effort: 2 TensorCores per chip on v7x, 1 on v5e/v6e."""
    try:
        kind = jax.devices()[0].device_kind.lower()
    except Exception:
        return 1
    return 2 if ("v7" in kind or "7x" in kind) else 1


def attention_layer_kernel(cv_ref, xyz_ref,
                           wq_ref, bq_ref,
                           wkv_ref, bkv_ref,
                           wv2_ref, bv2_ref,
                           ones_ref,
                           out_ref):
    """One batch tile of the packed AttentionLayer forward pass.

    cv_ref   : (TM, P*dim_cv)           VMEM  (P logical rows per lane row)
    xyz_ref  : (TM, P*dim_xyz)          VMEM
    wq_ref   : (P*dim_cv, P*dim_xyz)    VMEM  kron(I_P, Wq), resident
    wkv_ref  : (P*dim_xyz, 2*P*dim_xyz) VMEM  [kron(I_P,Wk) | kron(I_P,Wv)]
    wv2_ref  : (P*dim_xyz, P*dim_xyz)   VMEM  kron(I_P, Wv2)
    b*_ref   : (1, ...)                 VMEM  biases tiled P times along lanes
    ones_ref : (P*dim_xyz, P*dim_xyz)   VMEM  block-diagonal ones (segment sum)
    out_ref  : (TM, P*dim_xyz)          VMEM
    """
    f32 = jnp.float32
    d = out_ref.shape[-1]          # packed lane width = P * dim_xyz

    cv = cv_ref[...].astype(f32)
    xyz = xyz_ref[...].astype(f32)

    # q = tanh(cv @ Wq + bq), independently per packed segment.
    q = jnp.tanh(
        jnp.dot(cv, wq_ref[...], preferred_element_type=f32) + bq_ref[...])

    # Fused K/V projection: single MXU pass with a 2*d-wide RHS.
    kv = jnp.dot(xyz, wkv_ref[...], preferred_element_type=f32) + bkv_ref[...]
    k = jnp.tanh(kv[:, :d])        # tanh on the K half (lane-aligned slice)
    v = kv[:, d:]                  # Identity activation on the V half

    # softmax(q * k) per dim_xyz-lane segment.  q, k are tanh outputs so q*k
    # is in (-1, 1): exp cannot overflow -> no max-subtraction pass needed.
    e = jnp.exp(q * k)
    # Segment sums, broadcast to every lane of their own segment, via one MXU
    # pass against a block-diagonal ones matrix (the MXU has slack here).
    s = jnp.dot(e, ones_ref[...], preferred_element_type=f32)
    sm = e * pl.reciprocal(s, approx=True)   # EUP vrcp; frees VALU slots

    # qkv = tanh((sm * v) @ Wv2 + bv2), per packed segment.
    out = jnp.tanh(
        jnp.dot(sm * v, wv2_ref[...], preferred_element_type=f32)
        + bv2_ref[...])

    out_ref[...] = out.astype(out_ref.dtype)


def pack_params(params, dim_cv, dim_xyz, lanes=128):
    """Build lane-packed (block-diagonal) weights ONCE, outside the per-call
    jit path.  Returns the packed parameter tuple consumed by attention_layer.
    Falls back to pack factor 1 (original layout) when dim_xyz doesn't divide
    the 128-lane width.
    """
    wq, bq, wk, bk, wv, bv, wv2, bv2 = params
    p = lanes // dim_xyz if (lanes % dim_xyz == 0 and dim_xyz < lanes) else 1

    eye = jnp.eye(p, dtype=wq.dtype)

    def bd(w):                     # (din, dout) -> (p*din, p*dout) block-diag
        return jnp.kron(eye, w)

    def bt(b):                     # (1, dout)  -> (1, p*dout)
        return jnp.tile(b, (1, p))

    wq_p = bd(wq)
    bq_p = bt(bq)
    wkv_p = jnp.concatenate([bd(wk), bd(wv)], axis=1)   # (p*dx, 2*p*dx)
    bkv_p = jnp.concatenate([bt(bk), bt(bv)], axis=1)   # (1, 2*p*dx)
    wv2_p = bd(wv2)
    bv2_p = bt(bv2)

    seg = jnp.arange(p * dim_xyz) // dim_xyz
    ones_seg = (seg[:, None] == seg[None, :]).astype(wq.dtype)

    return (wq_p, bq_p, wkv_p, bkv_p, wv2_p, bv2_p, ones_seg)


@functools.partial(jax.jit, static_argnames=("tm",))
def attention_layer(cv_features, xyz, packed_params, *, tm=2048):
    """Pallas wrapper. cv_features: (N, dim_cv), xyz: (N, dim_xyz).

    packed_params comes from pack_params().  tm is the batch tile in LOGICAL
    rows (sweep 1024-4096 for large N); the packed tile is tm // P rows of
    P*dim_xyz lanes.  bf16 inputs are accepted (kernel computes in f32,
    output keeps the input dtype).
    """
    N, dim_cv = cv_features.shape
    _, dim_xyz = xyz.shape
    wq_p, bq_p, wkv_p, bkv_p, wv2_p, bv2_p, ones_seg = packed_params

    dpk = wv2_p.shape[1]           # packed lane width = P * dim_xyz
    p = dpk // dim_xyz             # pack factor
    dck = wq_p.shape[0]            # P * dim_cv

    # Pad the batch to a multiple of 8*P rows, then view the row-major
    # (N, dim) arrays as lane-dense (rows, P*dim) slabs (free reshape).
    n_pad = _round_up(N, 8 * p)
    if n_pad != N:
        cv_features = jnp.pad(cv_features, ((0, n_pad - N), (0, 0)))
        xyz = jnp.pad(xyz, ((0, n_pad - N), (0, 0)))
    rows = n_pad // p
    cv_pk = cv_features.reshape(rows, dck)
    xyz_pk = xyz.reshape(rows, dpk)

    # --- static tile / grid selection --------------------------------------
    num_tc = _num_tensorcores()
    tm_p = max(1, tm // p)
    tm_p = max(8, _round_up(min(tm_p, rows), 8))
    if rows <= tm_p:
        if num_tc >= 2 and rows >= 16 and rows % 16 == 0:
            tm_p = rows // 2       # exactly 2 grid steps -> both v7x TCs busy
        else:
            tm_p = rows            # single block (grid is sequential on 1 TC)
    elif num_tc >= 2:
        g = _cdiv(rows, tm_p)
        if g % 2 == 1:             # even grid -> equal split across 2 TCs
            cand = _round_up(_cdiv(rows, g + 1), 8)
            if cand >= 8 and _cdiv(rows, cand) % 2 == 0:
                tm_p = cand
    grid = (_cdiv(rows, tm_p),)

    def row_map(i):
        return (i, 0)

    def full_map(i):
        return (0, 0)

    out_pk = pl.pallas_call(
        attention_layer_kernel,
        out_shape=jax.ShapeDtypeStruct((rows, dpk), cv_features.dtype),
        grid_spec=pltpu.PrefetchScalarGridSpec(
            num_scalar_prefetch=0,
            grid=grid,
            in_specs=[
                pl.BlockSpec((tm_p, dck), row_map),        # packed cv_features
                pl.BlockSpec((tm_p, dpk), row_map),        # packed xyz
                pl.BlockSpec((dck, dpk), full_map),        # kron(I_P, Wq)
                pl.BlockSpec((1, dpk), full_map),          # tiled bq
                pl.BlockSpec((dpk, 2 * dpk), full_map),    # [kron Wk | kron Wv]
                pl.BlockSpec((1, 2 * dpk), full_map),      # [tiled bk | tiled bv]
                pl.BlockSpec((dpk, dpk), full_map),        # kron(I_P, Wv2)
                pl.BlockSpec((1, dpk), full_map),          # tiled bv2
                pl.BlockSpec((dpk, dpk), full_map),        # block-diag ones
            ],
            out_specs=pl.BlockSpec((tm_p, dpk), row_map),
        ),
        compiler_params=pltpu.CompilerParams(
            dimension_semantics=("parallel",)),
    )(cv_pk, xyz_pk, wq_p, bq_p, wkv_p, bkv_p, wv2_p, bv2_p, ones_seg)

    out = out_pk.reshape(n_pad, dim_xyz)
    return out[:N] if n_pad != N else out


def init_linear(key, in_features, out_features, dtype=jnp.float32):
    """PyTorch nn.Linear-style init: U(-1/sqrt(in), 1/sqrt(in)).
    Weight returned as (in_features, out_features) (transposed vs PyTorch)."""
    kw, kb = jax.random.split(key)
    bound = 1.0 / jnp.sqrt(jnp.array(in_features, dtype))
    w = jax.random.uniform(kw, (in_features, out_features), dtype,
                           minval=-bound, maxval=bound)
    b = jax.random.uniform(kb, (1, out_features), dtype,
                           minval=-bound, maxval=bound)
    return w, b


def reference_forward(cv_features, xyz, params):
    """Plain-JAX reference mirroring the PyTorch module (for validation)."""
    wq, bq, wk, bk, wv, bv, wv2, bv2 = params
    q = jnp.tanh(cv_features @ wq + bq)
    k = jnp.tanh(xyz @ wk + bk)
    v = xyz @ wv + bv
    qk = jax.nn.softmax(q * k, axis=-1)
    qkv = qk * v
    return jnp.tanh(qkv @ wv2 + bv2)


if __name__ == "__main__":
    # Shapes consistent with the module: dim_cv = dim_xyz = 32; batch large
    # enough to exercise the packed layout and multiple sublane tiles.
    N, DIM_CV, DIM_XYZ = 1024, 32, 32
    key = jax.random.PRNGKey(0)
    k_cv, k_xyz, kq, kk, kv, kv2 = jax.random.split(key, 6)

    cv_features = jax.random.normal(k_cv, (N, DIM_CV), jnp.float32)
    xyz = jax.random.normal(k_xyz, (N, DIM_XYZ), jnp.float32)

    wq, bq = init_linear(kq, DIM_CV, DIM_XYZ)
    wk, bk = init_linear(kk, DIM_XYZ, DIM_XYZ)
    wv, bv = init_linear(kv, DIM_XYZ, DIM_XYZ)
    wv2, bv2 = init_linear(kv2, DIM_XYZ, DIM_XYZ)
    params = (wq, bq, wk, bk, wv, bv, wv2, bv2)

    # Packed (block-diagonal) weights built once, outside the per-call jit.
    packed = pack_params(params, DIM_CV, DIM_XYZ)

    out = jax.block_until_ready(attention_layer(cv_features, xyz, packed))
    ref = reference_forward(cv_features, xyz, params)
    assert out.shape == (N, DIM_XYZ)
    # Tolerance covers the approximate (EUP) softmax reciprocal; everything
    # else is f32.
    assert jnp.allclose(out, ref, atol=5e-3, rtol=5e-3), "mismatch vs reference"

    # Ragged batch: exercises row padding to the pack factor + masked stores.
    n2 = 123
    out2 = jax.block_until_ready(
        attention_layer(cv_features[:n2], xyz[:n2], packed))
    ref2 = reference_forward(cv_features[:n2], xyz[:n2], params)
    assert out2.shape == (n2, DIM_XYZ)
    assert jnp.allclose(out2, ref2, atol=5e-3, rtol=5e-3), "ragged mismatch"

    print("KERNEL_OK")
</pallas_src>

<mosaic_0001>
module attributes {stable_mosaic.version = 11 : i64} {
  func.func @attention_layer_kernel(%arg0: i32, %arg1: memref<256x128xf32, #tpu.memory_space<vmem>>, %arg2: memref<256x128xf32, #tpu.memory_space<vmem>>, %arg3: memref<128x128xf32, #tpu.memory_space<vmem>>, %arg4: memref<1x128xf32, #tpu.memory_space<vmem>>, %arg5: memref<128x256xf32, #tpu.memory_space<vmem>>, %arg6: memref<1x256xf32, #tpu.memory_space<vmem>>, %arg7: memref<128x128xf32, #tpu.memory_space<vmem>>, %arg8: memref<1x128xf32, #tpu.memory_space<vmem>>, %arg9: memref<128x128xf32, #tpu.memory_space<vmem>>, %arg10: memref<256x128xf32, #tpu.memory_space<vmem>>) attributes {dimension_semantics = [#tpu.dimension_semantics<parallel>], iteration_bounds = array<i64: 1>, scalar_prefetch = 0 : i64, scratch_operands = 0 : i64, tpu.core_type = #tpu.core_type<tc>, window_params = [{transform_indices = @transform_0, window_bounds = array<i64: 256, 128>}, {transform_indices = @transform_1, window_bounds = array<i64: 256, 128>}, {pipeline_mode = #tpu.pipeline_mode<synchronous>, transform_indices = @transform_2, window_bounds = array<i64: 128, 128>}, {pipeline_mode = #tpu.pipeline_mode<synchronous>, transform_indices = @transform_3, window_bounds = array<i64: 1, 128>}, {pipeline_mode = #tpu.pipeline_mode<synchronous>, transform_indices = @transform_4, window_bounds = array<i64: 128, 256>}, {pipeline_mode = #tpu.pipeline_mode<synchronous>, transform_indices = @transform_5, window_bounds = array<i64: 1, 256>}, {pipeline_mode = #tpu.pipeline_mode<synchronous>, transform_indices = @transform_6, window_bounds = array<i64: 128, 128>}, {pipeline_mode = #tpu.pipeline_mode<synchronous>, transform_indices = @transform_7, window_bounds = array<i64: 1, 128>}, {pipeline_mode = #tpu.pipeline_mode<synchronous>, transform_indices = @transform_8, window_bounds = array<i64: 128, 128>}, {transform_indices = @transform_9, window_bounds = array<i64: 256, 128>}]} {
    %c0 = arith.constant 0 : index
    %c0_0 = arith.constant 0 : index
    %0 = vector.load %arg1[%c0, %c0_0] : memref<256x128xf32, #tpu.memory_space<vmem>>, vector<256x128xf32>
    %c0_1 = arith.constant 0 : index
    %c0_2 = arith.constant 0 : index
    %1 = vector.load %arg2[%c0_1, %c0_2] : memref<256x128xf32, #tpu.memory_space<vmem>>, vector<256x128xf32>
    %c0_3 = arith.constant 0 : index
    %c0_4 = arith.constant 0 : index
    %2 = vector.load %arg3[%c0_3, %c0_4] : memref<128x128xf32, #tpu.memory_space<vmem>>, vector<128x128xf32>
    %cst = arith.constant dense<0.000000e+00> : vector<256x128xf32>
    %3 = tpu.matmul %0, %2, %cst {dimension_numbers = #tpu.dot_dimension_numbers<[1], [0], [0], [1], [0, 0, 1, 1], [], []>} : vector<256x128xf32>, vector<128x128xf32>, vector<256x128xf32> -> vector<256x128xf32>
    %c0_5 = arith.constant 0 : index
    %c0_6 = arith.constant 0 : index
    %4 = vector.load %arg4[%c0_5, %c0_6] : memref<1x128xf32, #tpu.memory_space<vmem>>, vector<1x128xf32>
    %5 = vector.broadcast %4 : vector<1x128xf32> to vector<256x128xf32>
    %6 = arith.addf %3, %5 : vector<256x128xf32>
    %7 = math.tanh %6 : vector<256x128xf32>
    %c0_7 = arith.constant 0 : index
    %c0_8 = arith.constant 0 : index
    %8 = vector.load %arg5[%c0_7, %c0_8] : memref<128x256xf32, #tpu.memory_space<vmem>>, vector<128x256xf32>
    %cst_9 = arith.constant dense<0.000000e+00> : vector<256x256xf32>
    %9 = tpu.matmul %1, %8, %cst_9 {dimension_numbers = #tpu.dot_dimension_numbers<[1], [0], [0], [1], [0, 0, 1, 1], [], []>} : vector<256x128xf32>, vector<128x256xf32>, vector<256x256xf32> -> vector<256x256xf32>
    %c0_10 = arith.constant 0 : index
    %c0_11 = arith.constant 0 : index
    %10 = vector.load %arg6[%c0_10, %c0_11] : memref<1x256xf32, #tpu.memory_space<vmem>>, vector<1x256xf32>
    %11 = vector.broadcast %10 : vector<1x256xf32> to vector<256x256xf32>
    %12 = arith.addf %9, %11 : vector<256x256xf32>
    %13 = vector.extract_strided_slice %12 {offsets = [0, 0], sizes = [256, 128], strides = [1, 1]} : vector<256x256xf32> to vector<256x128xf32>
    %14 = math.tanh %13 : vector<256x128xf32>
    %15 = vector.extract_strided_slice %12 {offsets = [0, 128], sizes = [256, 128], strides = [1, 1]} : vector<256x256xf32> to vector<256x128xf32>
    %16 = arith.mulf %7, %14 : vector<256x128xf32>
    %17 = math.exp %16 : vector<256x128xf32>
    %c0_12 = arith.constant 0 : index
    %c0_13 = arith.constant 0 : index
    %18 = vector.load %arg9[%c0_12, %c0_13] : memref<128x128xf32, #tpu.memory_space<vmem>>, vector<128x128xf32>
    %cst_14 = arith.constant dense<0.000000e+00> : vector<256x128xf32>
    %19 = tpu.matmul %17, %18, %cst_14 {dimension_numbers = #tpu.dot_dimension_numbers<[1], [0], [0], [1], [0, 0, 1, 1], [], []>} : vector<256x128xf32>, vector<128x128xf32>, vector<256x128xf32> -> vector<256x128xf32>
    %20 = tpu.reciprocal %19 {approx = true} : vector<256x128xf32> -> vector<256x128xf32>
    %21 = arith.mulf %17, %20 : vector<256x128xf32>
    %22 = arith.mulf %21, %15 : vector<256x128xf32>
    %c0_15 = arith.constant 0 : index
    %c0_16 = arith.constant 0 : index
    %23 = vector.load %arg7[%c0_15, %c0_16] : memref<128x128xf32, #tpu.memory_space<vmem>>, vector<128x128xf32>
    %cst_17 = arith.constant dense<0.000000e+00> : vector<256x128xf32>
    %24 = tpu.matmul %22, %23, %cst_17 {dimension_numbers = #tpu.dot_dimension_numbers<[1], [0], [0], [1], [0, 0, 1, 1], [], []>} : vector<256x128xf32>, vector<128x128xf32>, vector<256x128xf32> -> vector<256x128xf32>
    %c0_18 = arith.constant 0 : index
    %c0_19 = arith.constant 0 : index
    %25 = vector.load %arg8[%c0_18, %c0_19] : memref<1x128xf32, #tpu.memory_space<vmem>>, vector<1x128xf32>
    %26 = vector.broadcast %25 : vector<1x128xf32> to vector<256x128xf32>
    %27 = arith.addf %24, %26 : vector<256x128xf32>
    %28 = math.tanh %27 : vector<256x128xf32>
    %c0_20 = arith.constant 0 : index
    %c0_21 = arith.constant 0 : index
    %29 = vector.load %arg10[%c0_20, %c0_21] : memref<256x128xf32, #tpu.memory_space<vmem>>, vector<256x128xf32>
    tpu.vector_store %arg10[%c0_20, %c0_21], %28 {strides = array<i32>} : memref<256x128xf32, #tpu.memory_space<vmem>>, vector<256x128xf32>,
    return
  }
  func.func @transform_0(%arg0: i32) -> (i32, i32) {
    %c0_i32 = arith.constant 0 : i32
    %c0_i32_0 = arith.constant 0 : i32
    return %arg0, %c0_i32 : i32, i32
  }
  func.func @transform_1(%arg0: i32) -> (i32, i32) {
    %c0_i32 = arith.constant 0 : i32
    %c0_i32_0 = arith.constant 0 : i32
    return %arg0, %c0_i32 : i32, i32
  }
  func.func @transform_2(%arg0: i32) -> (i32, i32) {
    %c0_i32 = arith.constant 0 : i32
    %c0_i32_0 = arith.constant 0 : i32
    %c0_i32_1 = arith.constant 0 : i32
    return %c0_i32, %c0_i32_0 : i32, i32
  }
  func.func @transform_3(%arg0: i32) -> (i32, i32) {
    %c0_i32 = arith.constant 0 : i32
    %c0_i32_0 = arith.constant 0 : i32
    %c0_i32_1 = arith.constant 0 : i32
    return %c0_i32, %c0_i32_0 : i32, i32
  }
  func.func @transform_4(%arg0: i32) -> (i32, i32) {
    %c0_i32 = arith.constant 0 : i32
    %c0_i32_0 = arith.constant 0 : i32
    %c0_i32_1 = arith.constant 0 : i32
    return %c0_i32, %c0_i32_0 : i32, i32
  }
  func.func @transform_5(%arg0: i32) -> (i32, i32) {
    %c0_i32 = arith.constant 0 : i32
    %c0_i32_0 = arith.constant 0 : i32
    %c0_i32_1 = arith.constant 0 : i32
    return %c0_i32, %c0_i32_0 : i32, i32
  }
  func.func @transform_6(%arg0: i32) -> (i32, i32) {
    %c0_i32 = arith.constant 0 : i32
    %c0_i32_0 = arith.constant 0 : i32
    %c0_i32_1 = arith.constant 0 : i32
    return %c0_i32, %c0_i32_0 : i32, i32
  }
  func.func @transform_7(%arg0: i32) -> (i32, i32) {
    %c0_i32 = arith.constant 0 : i32
    %c0_i32_0 = arith.constant 0 : i32
    %c0_i32_1 = arith.constant 0 : i32
    return %c0_i32, %c0_i32_0 : i32, i32
  }
  func.func @transform_8(%arg0: i32) -> (i32, i32) {
    %c0_i32 = arith.constant 0 : i32
    %c0_i32_0 = arith.constant 0 : i32
    %c0_i32_1 = arith.constant 0 : i32
    return %c0_i32, %c0_i32_0 : i32, i32
  }
  func.func @transform_9(%arg0: i32) -> (i32, i32) {
    %c0_i32 = arith.constant 0 : i32
    %c0_i32_0 = arith.constant 0 : i32
    return %arg0, %c0_i32 : i32, i32
  }
}

</mosaic_0001>

<bundles_post_ra>
// kernel: attention_layer.1
= control target key start
LH: loop header
LB: loop body
LE: loop exit
PB: predicated region body
PF: predicated region fallthrough
CT: control target
= control target key end

     0   :  { %s3378_s2 = inlined_call_operand.vmem [shape: f32[128,128], index: 2, kind: input, shape index: {}]   ;;  %s3379_s0 = inlined_call_operand.vmem [shape: f32[256,128], index: 0, kind: input, shape index: {}]   ;;  %s3380_s4 = inlined_call_operand.vmem [shape: f32[128,256], index: 4, kind: input, shape index: {}]   ;;  %s3381_s1 = inlined_call_operand.vmem [shape: f32[256,128], index: 1, kind: input, shape index: {}]   ;;  %s3382_s5 = inlined_call_operand.vmem [shape: f32[1,256], index: 5, kind: input, shape index: {}]   ;;  %s3383_s8 = inlined_call_operand.vmem [shape: f32[128,128], index: 8, kind: input, shape index: {}]   ;;  %s3384_s3 = inlined_call_operand.vmem [shape: f32[1,128], index: 3, kind: input, shape index: {}]   ;;  %s3385_s6 = inlined_call_operand.vmem [shape: f32[128,128], index: 6, kind: input, shape index: {}]   ;;  %s3386_s7 = inlined_call_operand.vmem [shape: f32[1,128], index: 7, kind: input, shape index: {}]   ;;  %s3387_s9 = inlined_call_operand.vmem [shape: f32[256,128], index: 9, kind: output, shape index: {}]  }
   0x1   :  { %v96_v0 = vld [vmem:[%s3378_s2] sm:$0xff]  ;;  %v97_v1 = vld [vmem:[%s3378_s2 + $0x8] sm:$0xff]  ;;  %v98_v2 = vld [vmem:[%s3378_s2 + $0x10] sm:$0xff] }
   0x2   :  { %v1844_v3 = vpack.c.bf16 %v97_v1, %v96_v0  ;;  %v99_v4 = vld [vmem:[%s3378_s2 + $0x18] sm:$0xff]  ;;  %v100_v6 = vld [vmem:[%s3378_s2 + $0x20] sm:$0xff]  ;;  %v101_v7 = vld [vmem:[%s3378_s2 + $0x28] sm:$0xff] }
   0x3   :  { %v1848_v5 = vpack.c.bf16 %v99_v4, %v98_v2  ;;  %v1852_v8 = vpack.c.bf16 %v101_v7, %v100_v6  ;;  %v48_v9 = vld [vmem:[%s3379_s0 + $0x80] sm:$0xff]  ;;  %v102_v10 = vld [vmem:[%s3378_s2 + $0x30] sm:$0xff]  ;;  %v103_v11 = vld [vmem:[%s3378_s2 + $0x38] sm:$0xff] }
   0x4   :  { %1972 = vmatprep.subr.bf16.mxu1 %v1844_v3  ;;  %1845 = vmatprep.subr.bf16.mxu0 %v1844_v3  ;;  %v1856_v12 = vpack.c.bf16 %v103_v11, %v102_v10  ;;  %v104_v13 = vld [vmem:[%s3378_s2 + $0x40] sm:$0xff]  ;;  %v105_v14 = vld [vmem:[%s3378_s2 + $0x48] sm:$0xff]  ;;  %v106_v16 = vld [vmem:[%s3378_s2 + $0x50] sm:$0xff] }
   0x5   :  { %1980 = vmatpush3.bf16.msra.mxu1 %v1844_v3  ;;  %1847 = vmatpush3.bf16.msra.mxu0 %v1844_v3  ;;  %v1860_v15 = vpack.c.bf16 %v105_v14, %v104_v13  ;;  %v107_v17 = vld [vmem:[%s3378_s2 + $0x58] sm:$0xff]  ;;  %v108_v19 = vld [vmem:[%s3378_s2 + $0x60] sm:$0xff]  ;;  %v109_v20 = vld [vmem:[%s3378_s2 + $0x68] sm:$0xff] }
   0x6   :  { %1973 = vmatprep.subr.bf16.mxu1 %v1848_v5  ;;  %1849 = vmatprep.subr.bf16.mxu0 %v1848_v5  ;;  %v1864_v18 = vpack.c.bf16 %v107_v17, %v106_v16  ;;  %v1868_v21 = vpack.c.bf16 %v109_v20, %v108_v19  ;;  %v32_v22 = vld [vmem:[%s3379_s0] sm:$0xff]  ;;  %v110_v23 = vld [vmem:[%s3378_s2 + $0x70] sm:$0xff]  ;;  %v111_v24 = vld [vmem:[%s3378_s2 + $0x78] sm:$0xff] }
   0x7   :  { %1660 = vmatprep.mubr.f32.mxu1 %v48_v9  ;;  %1636 = vmatprep.mubr.f32.mxu0 %v32_v22  ;;  %v1872_v25 = vpack.c.bf16 %v111_v24, %v110_v23  ;;  %v377_v26 = vld [vmem:[%s3380_s4 + $0x8] sm:$0xff]  ;;  %v379_v27 = vld [vmem:[%s3380_s4 + $0x18] sm:$0xff]  ;;  %v376_v29 = vld [vmem:[%s3380_s4] sm:$0xff] }
   0x8   :  { %v1876_v28 = vpack.c.bf16 %v379_v27, %v377_v26  ;;  %v378_v30 = vld [vmem:[%s3380_s4 + $0x10] sm:$0xff]  ;;  %v381_v31 = vld [vmem:[%s3380_s4 + $0x28] sm:$0xff]  ;;  %v383_v32 = vld [vmem:[%s3380_s4 + $0x38] sm:$0xff] }
   0x9   :  { %1981 = vmatpush3.bf16.msra.mxu1 %v1848_v5  ;;  %1851 = vmatpush3.bf16.msra.mxu0 %v1848_v5  ;;  %v49_v33 = vld [vmem:[%s3379_s0 + $0x88] sm:$0xff]  ;;  %v1878_v34 = vpack.c.bf16 %v378_v30, %v376_v29  ;;  %v50_v36 = vld [vmem:[%s3379_s0 + $0x90] sm:$0xff]  ;;  %v1880_v37 = vpack.c.bf16 %v383_v32, %v381_v31  ;;  %v380_v38 = vld [vmem:[%s3380_s4 + $0x20] sm:$0xff] }
   0xa   :  { %1974 = vmatprep.subr.bf16.mxu1 %v1852_v8  ;;  %1853 = vmatprep.subr.bf16.mxu0 %v1852_v8  ;;  %v33_v35 = vld [vmem:[%s3379_s0 + $0x8] sm:$0xff]  ;;  %v382_v39 = vld [vmem:[%s3380_s4 + $0x30] sm:$0xff]  ;;  %v387_v41 = vld [vmem:[%s3380_s4 + $0x58] sm:$0xff] }
   0xb   :  { %v385_v40 = vld [vmem:[%s3380_s4 + $0x48] sm:$0xff]  ;;  %v34_v42 = vld [vmem:[%s3379_s0 + $0x10] sm:$0xff]  ;;  %v51_v43 = vld [vmem:[%s3379_s0 + $0x98] sm:$0xff]  ;;  %v1882_v44 = vpack.c.bf16 %v382_v39, %v380_v38 }
   0xc   :  { %v35_v45 = vld [vmem:[%s3379_s0 + $0x18] sm:$0xff]  ;;  %v52_v46 = vld [vmem:[%s3379_s0 + $0xa0] sm:$0xff]  ;;  %v1884_v47 = vpack.c.bf16 %v387_v41, %v385_v40  ;;  %v386_v49 = vld [vmem:[%s3380_s4 + $0x50] sm:$0xff]  ;;  %v2309_v40 = vmov 0.0  }
   0xd   :  { %1982 = vmatpush3.bf16.msra.mxu1 %v1852_v8  ;;  %1855 = vmatpush3.bf16.msra.mxu0 %v1852_v8  ;;  %v384_v48 = vld [vmem:[%s3380_s4 + $0x40] sm:$0xff]  ;;  %v389_v50 = vld [vmem:[%s3380_s4 + $0x68] sm:$0xff]  ;;  %v391_v51 = vld [vmem:[%s3380_s4 + $0x78] sm:$0xff] }
   0xe   :  { %1975 = vmatprep.subr.bf16.mxu1 %v1856_v12  ;;  %1857 = vmatprep.subr.bf16.mxu0 %v1856_v12  ;;  %v36_v52 = vld [vmem:[%s3379_s0 + $0x20] sm:$0xff]  ;;  %v53_v53 = vld [vmem:[%s3379_s0 + $0xa8] sm:$0xff]  ;;  %v1886_v54 = vpack.c.bf16 %v386_v49, %v384_v48  ;;  %v54_v56 = vld [vmem:[%s3379_s0 + $0xb0] sm:$0xff]  ;;  %v1888_v57 = vpack.c.bf16 %v391_v51, %v389_v50 }
   0xf   :  { %v37_v55 = vld [vmem:[%s3379_s0 + $0x28] sm:$0xff]  ;;  %v388_v58 = vld [vmem:[%s3380_s4 + $0x60] sm:$0xff]  ;;  %v390_v59 = vld [vmem:[%s3380_s4 + $0x70] sm:$0xff] }
  0x10   :  { %v393_v60 = vld [vmem:[%s3380_s4 + $0x88] sm:$0xff]  ;;  %v395_v61 = vld [vmem:[%s3380_s4 + $0x98] sm:$0xff]  ;;  %v38_v62 = vld [vmem:[%s3379_s0 + $0x30] sm:$0xff]  ;;  %v1890_v0 = vpack.c.bf16 %v390_v59, %v388_v58 }
  0x11   :  { %1983 = vmatpush3.bf16.msra.mxu1 %v1856_v12  ;;  %1859 = vmatpush3.bf16.msra.mxu0 %v1856_v12  ;;  %v55_v63 = vld [vmem:[%s3379_s0 + $0xb8] sm:$0xff]  ;;  %v56_v2 = vld [vmem:[%s3379_s0 + $0xc0] sm:$0xff]  ;;  %v1892_v3 = vpack.c.bf16 %v395_v61, %v393_v60  ;;  %v394_v5 = vld [vmem:[%s3380_s4 + $0x90] sm:$0xff]  ;;  %v410_v61 = vlaneseq }
  0x12   :  { %1976 = vmatprep.subr.bf16.mxu1 %v1860_v15  ;;  %1861 = vmatprep.subr.bf16.mxu0 %v1860_v15  ;;  %v39_v1 = vld [vmem:[%s3379_s0 + $0x38] sm:$0xff]  ;;  %v392_v4 = vld [vmem:[%s3380_s4 + $0x80] sm:$0xff]  ;;  %v397_v6 = vld [vmem:[%s3380_s4 + $0xa8] sm:$0xff] }
  0x13   :  { %v399_v7 = vld [vmem:[%s3380_s4 + $0xb8] sm:$0xff]  ;;  %v40_v8 = vld [vmem:[%s3379_s0 + $0x40] sm:$0xff]  ;;  %v57_v9 = vld [vmem:[%s3379_s0 + $0xc8] sm:$0xff]  ;;  %v1894_v10 = vpack.c.bf16 %v394_v5, %v392_v4 }
  0x14   :  { %v41_v11 = vld [vmem:[%s3379_s0 + $0x48] sm:$0xff]  ;;  %v58_v12 = vld [vmem:[%s3379_s0 + $0xd0] sm:$0xff]  ;;  %v1896_v13 = vpack.c.bf16 %v399_v7, %v397_v6  ;;  %v396_v14 = vld [vmem:[%s3380_s4 + $0xa0] sm:$0xff] }
  0x15   :  { %1984 = vmatpush3.bf16.msra.mxu1 %v1860_v15  ;;  %1863 = vmatpush3.bf16.msra.mxu0 %v1860_v15  ;;  %v398_v15 = vld [vmem:[%s3380_s4 + $0xb0] sm:$0xff]  ;;  %v401_v16 = vld [vmem:[%s3380_s4 + $0xc8] sm:$0xff]  ;;  %v403_v17 = vld [vmem:[%s3380_s4 + $0xd8] sm:$0xff] }
  0x16   :  { %1977 = vmatprep.subr.bf16.mxu1 %v1864_v18  ;;  %1865 = vmatprep.subr.bf16.mxu0 %v1864_v18  ;;  %v59_v19 = vld [vmem:[%s3379_s0 + $0xd8] sm:$0xff]  ;;  %v1898_v20 = vpack.c.bf16 %v398_v15, %v396_v14  ;;  %v60_v22 = vld [vmem:[%s3379_s0 + $0xe0] sm:$0xff]  ;;  %v1900_v23 = vpack.c.bf16 %v403_v17, %v401_v16  ;;  %v405_v26 = vld [vmem:[%s3380_s4 + $0xe8] sm:$0xff] }
  0x17   :  { %v400_v24 = vld [vmem:[%s3380_s4 + $0xc0] sm:$0xff]  ;;  %v407_v27 = vld [vmem:[%s3380_s4 + $0xf8] sm:$0xff]  ;;  %v61_v29 = vld [vmem:[%s3379_s0 + $0xe8] sm:$0xff] }
  0x18   :  { %v45_v31 = vld [vmem:[%s3379_s0 + $0x68] sm:$0xff]  ;;  %v62_v32 = vld [vmem:[%s3379_s0 + $0xf0] sm:$0xff]  ;;  %v47_v39 = vld [vmem:[%s3379_s0 + $0x78] sm:$0xff] }
  0x19   :  { %1985 = vmatpush3.bf16.msra.mxu1 %v1864_v18  ;;  %1867 = vmatpush3.bf16.msra.mxu0 %v1864_v18  ;;  %v42_v18 = vld [vmem:[%s3379_s0 + $0x50] sm:$0xff]  ;;  %v64_v41 = vld [vmem:[%s3381_s1] sm:$0xff]  ;;  %v71_v48 = vld [vmem:[%s3381_s1 + $0x38] sm:$0xff] }
  0x1a   :  { %1978 = vmatprep.subr.bf16.mxu1 %v1868_v21  ;;  %1869 = vmatprep.subr.bf16.mxu0 %v1868_v21  ;;  %v72_v49 = vld [vmem:[%s3381_s1 + $0x40] sm:$0xff]  ;;  %v73_v50 = vld [vmem:[%s3381_s1 + $0x48] sm:$0xff]  ;;  %v74_v51 = vld [vmem:[%s3381_s1 + $0x50] sm:$0xff] }
  0x1b   :  { %v81_v58 = vld [vmem:[%s3381_s1 + $0x88] sm:$0xff]  ;;  %v82_v59 = vld [vmem:[%s3381_s1 + $0x90] sm:$0xff]  ;;  %v83_v60 = vld [vmem:[%s3381_s1 + $0x98] sm:$0xff] }
  0x1c   :  { %v806_v4 = vld [vmem:[%s3383_s8 + $0x8] sm:$0xff]  ;;  %v86_v7 = vld [vmem:[%s3381_s1 + $0xb0] sm:$0xff]  ;;  %v88_v15 = vld [vmem:[%s3381_s1 + $0xc0] sm:$0xff] }
  0x1d   :  { %1986 = vmatpush3.bf16.msra.mxu1 %v1868_v21  ;;  %1871 = vmatpush3.bf16.msra.mxu0 %v1868_v21  ;;  %v43_v21 = vld [vmem:[%s3379_s0 + $0x58] sm:$0xff]  ;;  %v811_v16 = vld [vmem:[%s3383_s8 + $0x30] sm:$0xff] }
  0x1e   :  { %1979 = vmatprep.subr.bf16.mxu1 %v1872_v25  ;;  %1873 = vmatprep.subr.bf16.mxu0 %v1872_v25  ;;  %v812_v17 = vld [vmem:[%s3383_s8 + $0x38] sm:$0xff] }
  0x21   :  { %1987 = vmatpush3.bf16.msra.mxu1 %v1872_v25  ;;  %1875 = vmatpush3.bf16.msra.mxu0 %v1872_v25  ;;  %v402_v25 = vld [vmem:[%s3380_s4 + $0xd0] sm:$0xff] }
  0x22   :  { %1877 = vmatprep.subr.bf16.mxu1 %v1876_v28  ;;  %v44_v28 = vld [vmem:[%s3379_s0 + $0x60] sm:$0xff]  ;;  %v1902_v30 = vpack.c.bf16 %v402_v25, %v400_v24  ;;  %v815_v24 = vld [vmem:[%s3383_s8 + $0x50] sm:$0xff]  ;;  %v816_v25 = vld [vmem:[%s3383_s8 + $0x58] sm:$0xff] }
  0x24   :  { %1661 = vmatmul.mubr.f32.vlgmr.msra.gmra.mrb[0].mxu1 %v49_v33  ;;  %1637 = vmatmul.mubr.f32.vlgmr.msra.gmra.mrb[0].mxu0 %v33_v35  ;;  %v1904_v33 = vpack.c.bf16 %v407_v27, %v405_v26  ;;  %v406_v35 = vld [vmem:[%s3380_s4 + $0xf0] sm:$0xff]  ;;  %v1928_v26 = vpack.c.bf16 %v816_v25, %v815_v24  ;;  %v91_v27 = vld [vmem:[%s3381_s1 + $0xd8] sm:$0xff] }
  0x25   :  { %1879 = vmatpush1.bf16.msra.mxu1 %v1878_v34  ;;  %1663 = vmatprep.mubr.f32.mxu1 %v50_v36  ;;  %v404_v34 = vld [vmem:[%s3380_s4 + $0xe0] sm:$0xff]  ;;  %v46_v36 = vld [vmem:[%s3379_s0 + $0x70] sm:$0xff] }
  0x26   :  { %1881 = vmatprep.subr.bf16.mxu1 %v1880_v37  ;;  %1639 = vmatprep.mubr.f32.mxu0 %v34_v42  ;;  %v63_v37 = vld [vmem:[%s3379_s0 + $0xf8] sm:$0xff]  ;;  %v1906_v38 = vpack.c.bf16 %v406_v35, %v404_v34  ;;  %v65_v42 = vld [vmem:[%s3381_s1 + $0x8] sm:$0xff] }
  0x27   :  { %v93_v35 = vld [vmem:[%s3381_s1 + $0xe8] sm:$0xff] }
  0x28   :  { %1664 = vmatmul.mubr.f32.gmra.mrb[2].mxu1 %v51_v43  ;;  %1640 = vmatmul.mubr.f32.gmra.mrb[2].mxu0 %v35_v45  ;;  %v66_v43 = vld [vmem:[%s3381_s1 + $0x10] sm:$0xff]  ;;  %v68_v45 = vld [vmem:[%s3381_s1 + $0x20] sm:$0xff] }
  0x29   :  { %1883 = vmatpush1.bf16.msra.mxu1 %v1882_v44  ;;  %1666 = vmatprep.mubr.f32.mxu1 %v52_v46  ;;  %v67_v44 = vld [vmem:[%s3381_s1 + $0x18] sm:$0xff]  ;;  %v69_v46 = vld [vmem:[%s3381_s1 + $0x28] sm:$0xff] }
  0x2a   :  { %1885 = vmatprep.subr.bf16.mxu1 %v1884_v47  ;;  %1642 = vmatprep.mubr.f32.mxu0 %v36_v52  ;;  %v70_v47 = vld [vmem:[%s3381_s1 + $0x30] sm:$0xff]  ;;  %v75_v52 = vld [vmem:[%s3381_s1 + $0x58] sm:$0xff] }
  0x2c   :  { %1667 = vmatmul.mubr.f32.gmra.mrb[4].mxu1 %v53_v53  ;;  %1643 = vmatmul.mubr.f32.gmra.mrb[4].mxu0 %v37_v55  ;;  %v76_v53 = vld [vmem:[%s3381_s1 + $0x60] sm:$0xff]  ;;  %v78_v55 = vld [vmem:[%s3381_s1 + $0x70] sm:$0xff] }
  0x2d   :  { %1887 = vmatpush1.bf16.msra.mxu1 %v1886_v54  ;;  %1669 = vmatprep.mubr.f32.mxu1 %v54_v56  ;;  %v77_v54 = vld [vmem:[%s3381_s1 + $0x68] sm:$0xff]  ;;  %v79_v56 = vld [vmem:[%s3381_s1 + $0x78] sm:$0xff] }
  0x2e   :  { %1889 = vmatprep.subr.bf16.mxu1 %v1888_v57  ;;  %1645 = vmatprep.mubr.f32.mxu0 %v38_v62  ;;  %v80_v57 = vld [vmem:[%s3381_s1 + $0x80] sm:$0xff] }
  0x2f   :  { %v84_v62 = vld [vmem:[%s3381_s1 + $0xa0] sm:$0xff] }
  0x30   :  { %1670 = vmatmul.mubr.f32.gmra.mrb[6].mxu1 %v55_v63  ;;  %1646 = vmatmul.mubr.f32.gmra.mrb[6].mxu0 %v39_v1  ;;  %v2684_v63 = vshrl.u32 %v410_v61, 7  ;;  %v2693_v1 = vld [vmem:[%s3382_s5] sm:$0x3] }
  0x31   :  { %1891 = vmatpush1.bf16.msra.mxu1 %v1890_v0  ;;  %1672 = vmatprep.mubr.f32.mxu1 %v56_v2  ;;  %v85_v0 = vld [vmem:[%s3381_s1 + $0xa8] sm:$0xff] }
  0x32   :  { %1893 = vmatprep.subr.bf16.mxu1 %v1892_v3  ;;  %1648 = vmatprep.mubr.f32.mxu0 %v40_v8  ;;  %v416_v2 = vsub.s32 1, %v2684_v63  ;;  %v805_v3 = vld [vmem:[%s3383_s8] sm:$0xff]  ;;  %v807_v8 = vld [vmem:[%s3383_s8 + $0x10] sm:$0xff] }
  0x33   :  { %v1908_v5 = vpack.c.bf16 %v806_v4, %v805_v3 }
  0x34   :  { %1673 = vmatmul.mubr.f32.gmra.mrb[8].mxu1 %v57_v9  ;;  %1649 = vmatmul.mubr.f32.gmra.mrb[8].mxu0 %v41_v11  ;;  %v2703_v6 = vrot.slane %v2693_v1, %v416_v2  ;;  %v808_v9 = vld [vmem:[%s3383_s8 + $0x18] sm:$0xff] }
  0x35   :  { %1895 = vmatpush1.bf16.msra.mxu1 %v1894_v10  ;;  %1675 = vmatprep.mubr.f32.mxu1 %v58_v12  ;;  %v1912_v10 = vpack.c.bf16 %v808_v9, %v807_v8  ;;  %v87_v11 = vld [vmem:[%s3381_s1 + $0xb8] sm:$0xff]  ;;  %v809_v12 = vld [vmem:[%s3383_s8 + $0x20] sm:$0xff] }
  0x36   :  { %1897 = vmatprep.subr.bf16.mxu1 %v1896_v13  ;;  %1651 = vmatprep.mubr.f32.mxu0 %v42_v18  ;;  %v810_v13 = vld [vmem:[%s3383_s8 + $0x28] sm:$0xff]  ;;  %v1920_v18 = vpack.c.bf16 %v812_v17, %v811_v16 }
  0x37   :  { %1909 = vmatprep.subr.bf16.mxu0 %v1908_v5  ;;  %v1916_v14 = vpack.c.bf16 %v810_v13, %v809_v12 }
  0x38   :  { %1676 = vmatmul.mubr.f32.gmra.mrb[10].mxu1 %v59_v19  ;;  %1652 = vmatmul.mubr.f32.gmra.mrb[10].mxu0 %v43_v21  ;;  %v89_v19 = vld [vmem:[%s3381_s1 + $0xc8] sm:$0xff] }
  0x39   :  { %1899 = vmatpush1.bf16.msra.mxu1 %v1898_v20  ;;  %1678 = vmatprep.mubr.f32.mxu1 %v60_v22  ;;  %v813_v20 = vld [vmem:[%s3383_s8 + $0x40] sm:$0xff]  ;;  %v814_v21 = vld [vmem:[%s3383_s8 + $0x48] sm:$0xff] }
  0x3a   :  { %1901 = vmatprep.subr.bf16.mxu1 %v1900_v23  ;;  %1654 = vmatprep.mubr.f32.mxu0 %v44_v28  ;;  %v1924_v22 = vpack.c.bf16 %v814_v21, %v813_v20  ;;  %v90_v23 = vld [vmem:[%s3381_s1 + $0xd0] sm:$0xff]  ;;  %v817_v28 = vld [vmem:[%s3383_s8 + $0x60] sm:$0xff] }
  0x3b   :  { %1911 = vmatpush3.bf16.msra.mxu0 %v1908_v5 }
  0x3c   :  { %1679 = vmatmul.mubr.f32.gmra.mrb[12].mxu1 %v61_v29  ;;  %1655 = vmatmul.mubr.f32.gmra.mrb[12].mxu0 %v45_v31  ;;  %v818_v29 = vld [vmem:[%s3383_s8 + $0x68] sm:$0xff]  ;;  %v92_v31 = vld [vmem:[%s3381_s1 + $0xe0] sm:$0xff] }
  0x3d   :  { %1903 = vmatpush1.bf16.msra.mxu1 %v1902_v30  ;;  %1681 = vmatprep.mubr.f32.mxu1 %v62_v32  ;;  %v1932_v30 = vpack.c.bf16 %v818_v29, %v817_v28  ;;  %v819_v32 = vld [vmem:[%s3383_s8 + $0x70] sm:$0xff] }
  0x3e   :  { %1905 = vmatprep.subr.bf16.mxu1 %v1904_v33  ;;  %1657 = vmatprep.mubr.f32.mxu0 %v46_v36  ;;  %v820_v33 = vld [vmem:[%s3383_s8 + $0x78] sm:$0xff]  ;;  %v94_v36 = vld [vmem:[%s3381_s1 + $0xf0] sm:$0xff] }
  0x3f   :  { %1913 = vmatprep.subr.bf16.mxu0 %v1912_v10  ;;  %v1936_v34 = vpack.c.bf16 %v820_v33, %v819_v32 }
  0x40   :  { %1682 = vmatmul.mubr.f32.gmra.mrb[14].mxu1 %v63_v37  ;;  %1658 = vmatmul.mubr.f32.gmra.mrb[14].mxu0 %v47_v39  ;;  %v95_v37 = vld [vmem:[%s3381_s1 + $0xf8] sm:$0xff] }
  0x41   :  { %1907 = vmatpush1.bf16.msra.mxu1 %v1906_v38  ;;  %484 = vmatprep.mubr.f32.mxu1 %v2309_v40  ;;  %v2790_v38 = vld [vmem:[%s3384_s3] ss:$0 sm:$0xff] }
  0x42   :  { %1915 = vmatpush3.bf16.msra.mxu0 %v1912_v10 }
  0x43   :  { %1917 = vmatprep.subr.bf16.mxu0 %v1916_v14 }
  0x44   :  { %485 = vmatmul.mubr.f32.vlgmr.msra.gmra.mrb[16].mxu1 %v64_v41 }
  0x45   :  { %490 = vmatprep.mubr.f32.mxu1 %v2309_v40 }
  0x46   :  { %1919 = vmatpush3.bf16.msra.mxu0 %v1916_v14 }
  0x47   :  { %1921 = vmatprep.subr.bf16.mxu0 %v1920_v18 }
  0x48   :  { %491 = vmatmul.mubr.f32.gmra.mrb[18].mxu1 %v65_v42 }
  0x49   :  { %496 = vmatprep.mubr.f32.mxu1 %v2309_v40 }
  0x4a   :  { %1923 = vmatpush3.bf16.msra.mxu0 %v1920_v18  ;;  %v412_v18 = vsub.s32 0, %v2684_v63 }
  0x4b   :  { %1925 = vmatprep.subr.bf16.mxu0 %v1924_v22 }
  0x4c   :  { %497 = vmatmul.mubr.f32.gmra.mrb[20].mxu1 %v66_v43  ;;  %v2859_v25 = vrot.slane %v2693_v1, %v412_v18 }
  0x4d   :  { %502 = vmatprep.mubr.f32.mxu1 %v2309_v40 }
  0x4e   :  { %1927 = vmatpush3.bf16.msra.mxu0 %v1924_v22 }
  0x4f   :  { %1929 = vmatprep.subr.bf16.mxu0 %v1928_v26 }
  0x50   :  { %503 = vmatmul.mubr.f32.gmra.mrb[22].mxu1 %v67_v44 }
  0x51   :  { %508 = vmatprep.mubr.f32.mxu1 %v2309_v40 }
  0x52   :  { %1931 = vmatpush3.bf16.msra.mxu0 %v1928_v26 }
  0x53   :  { %1933 = vmatprep.subr.bf16.mxu0 %v1932_v30 }
  0x54   :  { %509 = vmatmul.mubr.f32.gmra.mrb[24].mxu1 %v68_v45 }
  0x55   :  { %514 = vmatprep.mubr.f32.mxu1 %v2309_v40 }
  0x56   :  { %1935 = vmatpush3.bf16.msra.mxu0 %v1932_v30 }
  0x57   :  { %1937 = vmatprep.subr.bf16.mxu0 %v1936_v34 }
  0x58   :  { %515 = vmatmul.mubr.f32.gmra.mrb[26].mxu1 %v69_v46 }
  0x59   :  { %520 = vmatprep.mubr.f32.mxu1 %v2309_v40 }
  0x5a   :  { %1939 = vmatpush3.bf16.msra.mxu0 %v1936_v34 }
  0x5c   :  { %521 = vmatmul.mubr.f32.gmra.mrb[28].mxu1 %v70_v47 }
  0x5d   :  { %526 = vmatprep.mubr.f32.mxu1 %v2309_v40 }
  0x60   :  { %527 = vmatmul.mubr.f32.gmra.mrb[30].mxu1 %v71_v48 }
  0x61   :  { %532 = vmatprep.mubr.f32.mxu1 %v2309_v40 }
  0x64   :  { %533 = vmatmul.mubr.f32.gmra.mrb[32].mxu1 %v72_v49 }
  0x65   :  { %538 = vmatprep.mubr.f32.mxu1 %v2309_v40 }
  0x68   :  { %539 = vmatmul.mubr.f32.gmra.mrb[34].mxu1 %v73_v50 }
  0x69   :  { %544 = vmatprep.mubr.f32.mxu1 %v2309_v40 }
  0x6c   :  { %545 = vmatmul.mubr.f32.gmra.mrb[36].mxu1 %v74_v51 }
  0x6d   :  { %550 = vmatprep.mubr.f32.mxu1 %v2309_v40 }
  0x70   :  { %551 = vmatmul.mubr.f32.gmra.mrb[38].mxu1 %v75_v52 }
  0x71   :  { %556 = vmatprep.mubr.f32.mxu1 %v2309_v40 }
  0x74   :  { %557 = vmatmul.mubr.f32.gmra.mrb[40].mxu1 %v76_v53 }
  0x75   :  { %562 = vmatprep.mubr.f32.mxu1 %v2309_v40 }
  0x78   :  { %563 = vmatmul.mubr.f32.gmra.mrb[42].mxu1 %v77_v54 }
  0x79   :  { %568 = vmatprep.mubr.f32.mxu1 %v2309_v40 }
  0x7c   :  { %569 = vmatmul.mubr.f32.gmra.mrb[44].mxu1 %v78_v55 }
  0x7d   :  { %574 = vmatprep.mubr.f32.mxu1 %v2309_v40 }
  0x80   :  { %575 = vmatmul.mubr.f32.gmra.mrb[46].mxu1 %v79_v56 }
  0x81   :  { %580 = vmatprep.mubr.f32.mxu1 %v2309_v40 }
  0x84   :  { %581 = vmatmul.mubr.f32.gmra.mrb[48].mxu1 %v80_v57 }
  0x85   :  { %586 = vmatprep.mubr.f32.mxu1 %v2309_v40 }
  0x88   :  { %587 = vmatmul.mubr.f32.gmra.mrb[50].mxu1 %v81_v58 }
  0x89   :  { %592 = vmatprep.mubr.f32.mxu1 %v2309_v40 }
  0x8c   :  { %593 = vmatmul.mubr.f32.gmra.mrb[52].mxu1 %v82_v59 }
  0x8d   :  { %598 = vmatprep.mubr.f32.mxu1 %v2309_v40 }
  0x90   :  { %599 = vmatmul.mubr.f32.gmra.mrb[54].mxu1 %v83_v60 }
  0x91   :  { %604 = vmatprep.mubr.f32.mxu1 %v2309_v40 }
  0x94   :  { %605 = vmatmul.mubr.f32.gmra.mrb[56].mxu1 %v84_v62 }
  0x95   :  { %610 = vmatprep.mubr.f32.mxu1 %v2309_v40 }
  0x98   :  { %611 = vmatmul.mubr.f32.gmra.mrb[58].mxu1 %v85_v0 }
  0x99   :  { %616 = vmatprep.mubr.f32.mxu1 %v2309_v40 }
  0x9c   :  { %617 = vmatmul.mubr.f32.gmra.mrb[60].mxu1 %v86_v7 }
  0x9d   :  { %622 = vmatprep.mubr.f32.mxu1 %v2309_v40 }
  0xa0   :  { %623 = vmatmul.mubr.f32.gmra.mrb[62].mxu1 %v87_v11 }
  0xa1   :  { %628 = vmatprep.mubr.f32.mxu1 %v2309_v40 }
  0xa4   :  { %629 = vmatmul.mubr.f32.gmra.mrb[64].mxu1 %v88_v15 }
  0xa5   :  { %634 = vmatprep.mubr.f32.mxu1 %v2309_v40 }
  0xa8   :  { %635 = vmatmul.mubr.f32.gmra.mrb[66].mxu1 %v89_v19 }
  0xa9   :  { %640 = vmatprep.mubr.f32.mxu1 %v2309_v40 }
  0xac   :  { %641 = vmatmul.mubr.f32.gmra.mrb[68].mxu1 %v90_v23 }
  0xad   :  { %646 = vmatprep.mubr.f32.mxu1 %v2309_v40 }
  0xb0   :  { %647 = vmatmul.mubr.f32.gmra.mrb[70].mxu1 %v91_v27 }
  0xb1   :  { %652 = vmatprep.mubr.f32.mxu1 %v2309_v40 }
  0xb4   :  { %653 = vmatmul.mubr.f32.gmra.mrb[72].mxu1 %v92_v31 }
  0xb5   :  { %658 = vmatprep.mubr.f32.mxu1 %v2309_v40 }
  0xb8   :  { %659 = vmatmul.mubr.f32.gmra.mrb[74].mxu1 %v93_v35 }
  0xb9   :  { %664 = vmatprep.mubr.f32.mxu1 %v2309_v40 }
  0xbc   :  { %665 = vmatmul.mubr.f32.gmra.mrb[76].mxu1 %v94_v36 }
  0xbd   :  { %670 = vmatprep.mubr.f32.mxu1 %v2309_v40 }
  0xc0   :  { %671 = vmatmul.mubr.f32.gmra.mrb[78].mxu1 %v95_v37 }
  0xf7   :  { %v1662_v39 = vpop.f32.mrb[0].mxu1  ;;  %v1638_v41 = vpop.f32.mrb[0].mxu0 }
  0xf8   :  { %v2793_v42 = vadd.f32 %v1662_v39, %v2790_v38  ;;  %v265_v43 = vpop.f32.mrb[1].mxu1  ;;  %v185_v44 = vpop.f32.mrb[1].mxu0  ;;  %v191_v29 = vadd.f32 %v1638_v41, %v2790_v38 }
  0xf9   :  { %v2796_v45 = vadd.f32 %v2790_v38, %v265_v43  ;;  %v186_v26 = vadd.f32 %v2790_v38, %v185_v44 }
  0xfb   :  { %v1665_v40 = vpop.f32.mrb[2].mxu1  ;;  %v1641_v46 = vpop.f32.mrb[2].mxu0  ;;  %1989 = vtanh.f32 %v186_v26 }
  0xfc   :  { %v2799_v47 = vadd.f32 %v1665_v40, %v2790_v38  ;;  %v275_v48 = vpop.f32.mrb[3].mxu1  ;;  %v195_v49 = vpop.f32.mrb[3].mxu0  ;;  %v201_v36 = vadd.f32 %v1641_v46, %v2790_v38 }
  0xfd   :  { %v2802_v50 = vadd.f32 %v2790_v38, %v275_v48  ;;  %v196_v34 = vadd.f32 %v2790_v38, %v195_v49 }
  0xff   :  { %v1668_v51 = vpop.f32.mrb[4].mxu1  ;;  %v2804_v52 = vpop.f32.mrb[4].mxu0 }
 0x100   :  { %v2807_v53 = vadd.f32 %v1668_v51, %v2790_v38  ;;  %v285_v54 = vpop.f32.mrb[5].mxu1  ;;  %v205_v55 = vpop.f32.mrb[5].mxu0 }
 0x101   :  { %v2810_v56 = vadd.f32 %v2790_v38, %v285_v54  ;;  %v206_v49 = vadd.f32 %v2790_v38, %v205_v55 }
 0x103   :  { %v1671_v57 = vpop.f32.mrb[6].mxu1  ;;  %v2812_v58 = vpop.f32.mrb[6].mxu0 }
 0x104   :  { %v2815_v59 = vadd.f32 %v1671_v57, %v2790_v38  ;;  %v295_v60 = vpop.f32.mrb[7].mxu1  ;;  %v2817_v61 = vpop.f32.mrb[7].mxu0 }
 0x105   :  { %v2820_v62 = vadd.f32 %v2790_v38, %v295_v60  ;;  %v1990_v41 = vpop.eup %1989 }
 0x107   :  { %v1674_v0 = vpop.f32.mrb[8].mxu1  ;;  %v2822_v2 = vpop.f32.mrb[8].mxu0 }
 0x108   :  { %v2825_v3 = vadd.f32 %v1674_v0, %v2790_v38  ;;  %v305_v4 = vpop.f32.mrb[9].mxu1  ;;  %v2827_v5 = vpop.f32.mrb[9].mxu0  ;;  %v211_v0 = vadd.f32 %v2804_v52, %v2790_v38  ;;  %v216_v52 = vadd.f32 %v2790_v38, %v2817_v61  ;;  %v1142_v61 = vld [vmem:[%s3385_s6] sm:$0xff] }
 0x109   :  { %v2830_v7 = vadd.f32 %v2790_v38, %v305_v4 }
 0x10b   :  { %v1677_v8 = vpop.f32.mrb[10].mxu1  ;;  %v2832_v9 = vpop.f32.mrb[10].mxu0 }
 0x10c   :  { %v2835_v10 = vadd.f32 %v1677_v8, %v2790_v38  ;;  %v315_v11 = vpop.f32.mrb[11].mxu1  ;;  %v2837_v12 = vpop.f32.mrb[11].mxu0 }
 0x10d   :  { %v2840_v13 = vadd.f32 %v2790_v38, %v315_v11 }
 0x10f   :  { %v1680_v14 = vpop.f32.mrb[12].mxu1  ;;  %v2842_v15 = vpop.f32.mrb[12].mxu0 }
 0x110   :  { %v2845_v16 = vadd.f32 %v1680_v14, %v2790_v38  ;;  %v325_v17 = vpop.f32.mrb[13].mxu1  ;;  %v2848_v19 = vpop.f32.mrb[13].mxu0 }
 0x111   :  { %v2851_v20 = vadd.f32 %v2790_v38, %v325_v17 }
 0x113   :  { %v1683_v21 = vpop.f32.mrb[14].mxu1  ;;  %v2853_v22 = vpop.f32.mrb[14].mxu0 }
 0x114   :  { %v2856_v23 = vadd.f32 %v1683_v21, %v2790_v38  ;;  %v335_v24 = vpop.f32.mrb[15].mxu1  ;;  %v2862_v27 = vpop.f32.mrb[15].mxu0 }
 0x115   :  { %v2865_v63 = vadd.f32 %v2790_v38, %v335_v24 }
 0x117   :  { %v486_v28 = vpop.f32.mrb[16].mxu1 }
 0x118   :  { %v487_v30 = vadd.f32 %v486_v28, %v2859_v25  ;;  %v2869_v31 = vpop.f32.mrb[17].mxu1 }
 0x11a   :  { %1991 = vtanh.f32 %v487_v30 }
 0x11b   :  { %v492_v32 = vpop.f32.mrb[18].mxu1  ;;  %1993 = vtanh.f32 %v191_v29 }
 0x11c   :  { %v493_v1 = vadd.f32 %v492_v32, %v2859_v25  ;;  %v2872_v33 = vpop.f32.mrb[19].mxu1 }
 0x11e   :  { %1995 = vtanh.f32 %v493_v1  ;;  %v221_v1 = vadd.f32 %v2812_v58, %v2790_v38 }
 0x11f   :  { %v498_v35 = vpop.f32.mrb[20].mxu1  ;;  %1997 = vtanh.f32 %v196_v34 }
 0x120   :  { %v499_v37 = vadd.f32 %v498_v35, %v2859_v25  ;;  %v2877_v39 = vpop.f32.mrb[21].mxu1 }
 0x122   :  { %1999 = vtanh.f32 %v499_v37  ;;  %v1143_v37 = vld [vmem:[%s3385_s6 + $0x8] sm:$0xff] }
 0x123   :  { %v504_v43 = vpop.f32.mrb[22].mxu1  ;;  %2001 = vtanh.f32 %v201_v36 }
 0x124   :  { %v1992_v44 = vpop.eup %1991  ;;  %v505_v40 = vadd.f32 %v504_v43, %v2859_v25  ;;  %v2880_v48 = vpop.f32.mrb[23].mxu1  ;;  %v1940_v43 = vpack.c.bf16 %v1143_v37, %v1142_v61  ;;  %v1149_v61 = vld [vmem:[%s3385_s6 + $0x38] sm:$0xff] }
 0x125   :  { %v709_v51 = vmul.f32 %v1992_v44, %v1990_v41  ;;  %v1994_v54 = vpop.eup %1993 }
 0x126   :  { %2003 = vtanh.f32 %v505_v40  ;;  %1941 = vmatprep.subr.bf16.mxu0 %v1940_v43 }
 0x127   :  { %v741_v46 = vmul.f32 1.442695, %v709_v51  ;;  %v510_v57 = vpop.f32.mrb[24].mxu1  ;;  %2005 = vtanh.f32 %v206_v49  ;;  %v1144_v49 = vld [vmem:[%s3385_s6 + $0x10] sm:$0xff]  ;;  %v1145_v51 = vld [vmem:[%s3385_s6 + $0x18] sm:$0xff] }
 0x128   :  { %v1996_v60 = vpop.eup %1995  ;;  %v511_v4 = vadd.f32 %v510_v57, %v2859_v25  ;;  %v2886_v8 = vpop.f32.mrb[25].mxu1 }
 0x129   :  { %2007 = vpow2.f32 %v741_v46  ;;  %v710_v11 = vmul.f32 %v1996_v60, %v1994_v54  ;;  %v1998_v14 = vpop.eup %1997  ;;  %v226_v60 = vadd.f32 %v2790_v38, %v2827_v5  ;;  %v231_v5 = vadd.f32 %v2822_v2, %v2790_v38  ;;  %v1148_v2 = vld [vmem:[%s3385_s6 + $0x30] sm:$0xff] }
 0x12a   :  { %2009 = vtanh.f32 %v511_v4 }
 0x12b   :  { %v743_v17 = vmul.f32 1.442695, %v710_v11  ;;  %v516_v55 = vpop.f32.mrb[26].mxu1  ;;  %2011 = vtanh.f32 %v211_v0  ;;  %v1944_v11 = vpack.c.bf16 %v1145_v51, %v1144_v49  ;;  %v1952_v51 = vpack.c.bf16 %v1149_v61, %v1148_v2 }
 0x12c   :  { %v2000_v18 = vpop.eup %1999  ;;  %v517_v21 = vadd.f32 %v516_v55, %v2859_v25  ;;  %v2889_v24 = vpop.f32.mrb[27].mxu1 }
 0x12d   :  { %2013 = vpow2.f32 %v743_v17  ;;  %v711_v26 = vmul.f32 %v2000_v18, %v1998_v14  ;;  %v2002_v28 = vpop.eup %2001  ;;  %v1146_v18 = vld [vmem:[%s3385_s6 + $0x20] sm:$0xff] }
 0x12e   :  { %2015 = vtanh.f32 %v517_v21  ;;  %v1147_v21 = vld [vmem:[%s3385_s6 + $0x28] sm:$0xff] }
 0x12f   :  { %v745_v29 = vmul.f32 1.442695, %v711_v26  ;;  %v522_v30 = vpop.f32.mrb[28].mxu1  ;;  %2017 = vtanh.f32 %v216_v52 }
 0x130   :  { %v2004_v32 = vpop.eup %2003  ;;  %v523_v34 = vadd.f32 %v522_v30, %v2859_v25  ;;  %v2896_v35 = vpop.f32.mrb[29].mxu1 }
 0x131   :  { %2019 = vpow2.f32 %v745_v29  ;;  %v712_v36 = vmul.f32 %v2004_v32, %v2002_v28  ;;  %v2006_v41 = vpop.eup %2005  ;;  %v1948_v32 = vpack.c.bf16 %v1147_v21, %v1146_v18 }
 0x132   :  { %2021 = vtanh.f32 %v523_v34 }
 0x133   :  { %v2904_v44 = vpop.eup %2007  ;;  %v747_v58 = vmul.f32 1.442695, %v712_v36  ;;  %v528_v40 = vpop.f32.mrb[30].mxu1  ;;  %2023 = vtanh.f32 %v221_v1 }
 0x134   :  { %v2010_v54 = vpop.eup %2009  ;;  %v529_v46 = vadd.f32 %v528_v40, %v2859_v25  ;;  %v2913_v57 = vpop.f32.mrb[31].mxu1  ;;  %1716 = vmatprep.mubr.f32.mxu0 %v2904_v44 }
 0x135   :  { %2025 = vpow2.f32 %v747_v58  ;;  %v713_v0 = vmul.f32 %v2010_v54, %v2006_v41  ;;  %v2012_v4 = vpop.eup %2011  ;;  %v236_v58 = vadd.f32 %v2790_v38, %v2837_v12 }
 0x136   :  { %2027 = vtanh.f32 %v529_v46 }
 0x137   :  { %v2918_v14 = vpop.eup %2013  ;;  %v749_v17 = vmul.f32 1.442695, %v713_v0  ;;  %v534_v55 = vpop.f32.mrb[32].mxu1  ;;  %2029 = vtanh.f32 %v226_v60 }
 0x138   :  { %v2016_v52 = vpop.eup %2015  ;;  %v535_v26 = vadd.f32 %v534_v55, %v2859_v25  ;;  %v2929_v28 = vpop.f32.mrb[33].mxu1  ;;  %1717 = vmatmul.mubr.f32.vlgmr.msra.gmra.mrb[16].mxu0 %v2918_v14 }
 0x139   :  { %2031 = vpow2.f32 %v749_v17  ;;  %v714_v29 = vmul.f32 %v2016_v52, %v2012_v4  ;;  %1943 = vmatpush3.bf16.msra.mxu0 %v1940_v43  ;;  %v2018_v30 = vpop.eup %2017  ;;  %v241_v4 = vadd.f32 %v2832_v9, %v2790_v38 }
 0x13a   :  { %2033 = vtanh.f32 %v535_v26  ;;  %1945 = vmatprep.subr.bf16.mxu0 %v1944_v11 }
 0x13b   :  { %v2932_v1 = vpop.eup %2019  ;;  %v751_v34 = vmul.f32 1.442695, %v714_v29  ;;  %v540_v36 = vpop.f32.mrb[34].mxu1  ;;  %2035 = vtanh.f32 %v231_v5  ;;  %v246_v29 = vadd.f32 %v2790_v38, %v2848_v19 }
 0x13c   :  { %v2022_v37 = vpop.eup %2021  ;;  %v541_v41 = vadd.f32 %v540_v36, %v2859_v25  ;;  %v2941_v43 = vpop.f32.mrb[35].mxu1  ;;  %1719 = vmatprep.mubr.f32.mxu0 %v2932_v1 }
 0x13d   :  { %2037 = vpow2.f32 %v751_v34  ;;  %v715_v40 = vmul.f32 %v2022_v37, %v2018_v30  ;;  %1947 = vmatpush3.bf16.msra.mxu0 %v1944_v11  ;;  %v2024_v49 = vpop.eup %2023  ;;  %v251_v37 = vadd.f32 %v2842_v15, %v2790_v38 }
 0x13e   :  { %2039 = vtanh.f32 %v541_v41  ;;  %1949 = vmatprep.subr.bf16.mxu0 %v1948_v32 }
 0x13f   :  { %v2946_v54 = vpop.eup %2025  ;;  %v753_v46 = vmul.f32 1.442695, %v715_v40  ;;  %v546_v60 = vpop.f32.mrb[36].mxu1  ;;  %2041 = vtanh.f32 %v236_v58 }
 0x140   :  { %v2028_v0 = vpop.eup %2027  ;;  %v547_v17 = vadd.f32 %v546_v60, %v2859_v25  ;;  %v2951_v55 = vpop.f32.mrb[37].mxu1  ;;  %1720 = vmatmul.mubr.f32.gmra.mrb[18].mxu0 %v2946_v54 }
 0x141   :  { %2043 = vpow2.f32 %v753_v46  ;;  %v716_v12 = vmul.f32 %v2028_v0, %v2024_v49  ;;  %1951 = vmatpush3.bf16.msra.mxu0 %v1948_v32  ;;  %v2030_v11 = vpop.eup %2029 }
 0x142   :  { %2045 = vtanh.f32 %v547_v17  ;;  %1953 = vmatprep.subr.bf16.mxu0 %v1952_v51 }
 0x143   :  { %v2954_v18 = vpop.eup %2031  ;;  %v755_v21 = vmul.f32 1.442695, %v716_v12  ;;  %v552_v52 = vpop.f32.mrb[38].mxu1  ;;  %2047 = vtanh.f32 %v241_v4  ;;  %v256_v4 = vadd.f32 %v2790_v38, %v2862_v27 }
 0x144   :  { %v2034_v5 = vpop.eup %2033  ;;  %v553_v9 = vadd.f32 %v552_v52, %v2859_v25  ;;  %v2957_v26 = vpop.f32.mrb[39].mxu1  ;;  %1722 = vmatprep.mubr.f32.mxu0 %v2954_v18 }
 0x145   :  { %2049 = vpow2.f32 %v755_v21  ;;  %v717_v30 = vmul.f32 %v2034_v5, %v2030_v11  ;;  %1955 = vmatpush3.bf16.msra.mxu0 %v1952_v51  ;;  %v2036_v32 = vpop.eup %2035 }
 0x146   :  { %2051 = vtanh.f32 %v553_v9  ;;  %v261_v9 = vadd.f32 %v2853_v22, %v2790_v38 }
 0x147   :  { %v2962_v34 = vpop.eup %2037  ;;  %v757_v36 = vmul.f32 1.442695, %v717_v30  ;;  %v558_v2 = vpop.f32.mrb[40].mxu1  ;;  %2053 = vtanh.f32 %v246_v29 }
 0x148   :  { %v2040_v61 = vpop.eup %2039  ;;  %v559_v41 = vadd.f32 %v558_v2, %v2859_v25  ;;  %v2967_v58 = vpop.f32.mrb[41].mxu1  ;;  %1723 = vmatmul.mubr.f32.gmra.mrb[20].mxu0 %v2962_v34 }
 0x149   :  { %2055 = vpow2.f32 %v757_v36  ;;  %v718_v19 = vmul.f32 %v2040_v61, %v2036_v32  ;;  %v2042_v40 = vpop.eup %2041 }
 0x14a   :  { %2057 = vtanh.f32 %v559_v41 }
 0x14b   :  { %v2970_v49 = vpop.eup %2043  ;;  %v759_v51 = vmul.f32 1.442695, %v718_v19  ;;  %v564_v46 = vpop.f32.mrb[42].mxu1  ;;  %2059 = vtanh.f32 %v251_v37 }
 0x14c   :  { %v2046_v60 = vpop.eup %2045  ;;  %v565_v0 = vadd.f32 %v564_v46, %v2859_v25  ;;  %v2973_v15 = vpop.f32.mrb[43].mxu1  ;;  %1725 = vmatprep.mubr.f32.mxu0 %v2970_v49 }
 0x14d   :  { %2061 = vpow2.f32 %v759_v51  ;;  %v719_v17 = vmul.f32 %v2046_v60, %v2042_v40  ;;  %v2048_v12 = vpop.eup %2047 }
 0x14e   :  { %2063 = vtanh.f32 %v565_v0 }
 0x14f   :  { %v2978_v11 = vpop.eup %2049  ;;  %v761_v21 = vmul.f32 1.442695, %v719_v17  ;;  %v570_v52 = vpop.f32.mrb[44].mxu1  ;;  %2065 = vtanh.f32 %v256_v4 }
 0x150   :  { %v2052_v5 = vpop.eup %2051  ;;  %v571_v29 = vadd.f32 %v570_v52, %v2859_v25  ;;  %v2983_v30 = vpop.f32.mrb[45].mxu1  ;;  %1726 = vmatmul.mubr.f32.gmra.mrb[22].mxu0 %v2978_v11 }
 0x151   :  { %2067 = vpow2.f32 %v761_v21  ;;  %v720_v27 = vmul.f32 %v2052_v5, %v2048_v12  ;;  %v2054_v32 = vpop.eup %2053 }
 0x152   :  { %2069 = vtanh.f32 %v571_v29 }
 0x153   :  { %v2986_v36 = vpop.eup %2055  ;;  %v763_v2 = vmul.f32 1.442695, %v720_v27  ;;  %v576_v61 = vpop.f32.mrb[46].mxu1  ;;  %2071 = vtanh.f32 %v261_v9 }
 0x154   :  { %v2058_v37 = vpop.eup %2057  ;;  %v577_v41 = vadd.f32 %v576_v61, %v2859_v25  ;;  %v2989_v38 = vpop.f32.mrb[47].mxu1  ;;  %1728 = vmatprep.mubr.f32.mxu0 %v2986_v36 }
 0x155   :  { %2073 = vpow2.f32 %v763_v2  ;;  %v721_v22 = vmul.f32 %v2058_v37, %v2054_v32  ;;  %v2060_v19 = vpop.eup %2059 }
 0x156   :  { %2075 = vtanh.f32 %v577_v41 }
 0x157   :  { %v2992_v40 = vpop.eup %2061  ;;  %v765_v51 = vmul.f32 1.442695, %v721_v22  ;;  %v582_v46 = vpop.f32.mrb[48].mxu1  ;;  %2077 = vtanh.f32 %v2796_v45 }
 0x158   :  { %v2064_v60 = vpop.eup %2063  ;;  %v583_v0 = vadd.f32 %v582_v46, %v2859_v25  ;;  %v2996_v4 = vpop.f32.mrb[49].mxu1  ;;  %1729 = vmatmul.mubr.f32.gmra.mrb[24].mxu0 %v2992_v40 }
 0x159   :  { %2079 = vpow2.f32 %v765_v51  ;;  %v722_v17 = vmul.f32 %v2064_v60, %v2060_v19  ;;  %v2066_v12 = vpop.eup %2065 }
 0x15a   :  { %2081 = vtanh.f32 %v583_v0 }
 0x15b   :  { %v2999_v21 = vpop.eup %2067  ;;  %v767_v52 = vmul.f32 1.442695, %v722_v17  ;;  %v588_v5 = vpop.f32.mrb[50].mxu1  ;;  %2083 = vtanh.f32 %v2793_v42 }
 0x15c   :  { %v2070_v9 = vpop.eup %2069  ;;  %v589_v29 = vadd.f32 %v588_v5, %v2859_v25  ;;  %v3003_v45 = vpop.f32.mrb[51].mxu1  ;;  %1731 = vmatprep.mubr.f32.mxu0 %v2999_v21 }
 0x15d   :  { %2085 = vpow2.f32 %v767_v52  ;;  %v723_v27 = vmul.f32 %v2070_v9, %v2066_v12  ;;  %v2072_v32 = vpop.eup %2071 }
 0x15e   :  { %2087 = vtanh.f32 %v589_v29 }
 0x15f   :  { %v3006_v2 = vpop.eup %2073  ;;  %v769_v61 = vmul.f32 1.442695, %v723_v27  ;;  %v594_v37 = vpop.f32.mrb[52].mxu1  ;;  %2089 = vtanh.f32 %v2802_v50 }
 0x160   :  { %v2076_v41 = vpop.eup %2075  ;;  %v595_v22 = vadd.f32 %v594_v37, %v2859_v25  ;;  %v3010_v42 = vpop.f32.mrb[53].mxu1  ;;  %1732 = vmatmul.mubr.f32.gmra.mrb[26].mxu0 %v3006_v2 }
 0x161   :  { %2091 = vpow2.f32 %v769_v61  ;;  %v724_v19 = vmul.f32 %v2076_v41, %v2072_v32  ;;  %v2078_v51 = vpop.eup %2077 }
 0x162   :  { %2093 = vtanh.f32 %v595_v22 }
 0x163   :  { %v3013_v46 = vpop.eup %2079  ;;  %v771_v60 = vmul.f32 1.442695, %v724_v19  ;;  %v600_v0 = vpop.f32.mrb[54].mxu1  ;;  %2095 = vtanh.f32 %v2799_v47 }
 0x164   :  { %v2082_v17 = vpop.eup %2081  ;;  %v601_v12 = vadd.f32 %v600_v0, %v2859_v25  ;;  %v3017_v50 = vpop.f32.mrb[55].mxu1  ;;  %1734 = vmatprep.mubr.f32.mxu0 %v3013_v46 }
 0x165   :  { %2097 = vpow2.f32 %v771_v60  ;;  %v725_v52 = vmul.f32 %v2082_v17, %v2078_v51  ;;  %v2084_v5 = vpop.eup %2083 }
 0x166   :  { %2099 = vtanh.f32 %v601_v12 }
 0x167   :  { %v3020_v9 = vpop.eup %2085  ;;  %v773_v29 = vmul.f32 1.442695, %v725_v52  ;;  %v606_v27 = vpop.f32.mrb[56].mxu1  ;;  %2101 = vtanh.f32 %v2810_v56 }
 0x168   :  { %v2088_v32 = vpop.eup %2087  ;;  %v607_v61 = vadd.f32 %v606_v27, %v2859_v25  ;;  %v3024_v47 = vpop.f32.mrb[57].mxu1  ;;  %1735 = vmatmul.mubr.f32.gmra.mrb[28].mxu0 %v3020_v9 }
 0x169   :  { %2103 = vpow2.f32 %v773_v29  ;;  %v726_v37 = vmul.f32 %v2088_v32, %v2084_v5  ;;  %v2090_v41 = vpop.eup %2089 }
 0x16a   :  { %2105 = vtanh.f32 %v607_v61 }
 0x16b   :  { %v3027_v22 = vpop.eup %2091  ;;  %v775_v19 = vmul.f32 1.442695, %v726_v37  ;;  %v612_v51 = vpop.f32.mrb[58].mxu1  ;;  %2107 = vtanh.f32 %v2807_v53 }
 0x16c   :  { %v2094_v60 = vpop.eup %2093  ;;  %v613_v0 = vadd.f32 %v612_v51, %v2859_v25  ;;  %v3031_v56 = vpop.f32.mrb[59].mxu1  ;;  %1737 = vmatprep.mubr.f32.mxu0 %v3027_v22 }
 0x16d   :  { %2109 = vpow2.f32 %v775_v19  ;;  %v727_v17 = vmul.f32 %v2094_v60, %v2090_v41  ;;  %v2096_v12 = vpop.eup %2095 }
 0x16e   :  { %2111 = vtanh.f32 %v613_v0 }
 0x16f   :  { %v3034_v52 = vpop.eup %2097  ;;  %v777_v5 = vmul.f32 1.442695, %v727_v17  ;;  %v618_v29 = vpop.f32.mrb[60].mxu1  ;;  %2113 = vtanh.f32 %v2820_v62 }
 0x170   :  { %v2100_v27 = vpop.eup %2099  ;;  %v619_v32 = vadd.f32 %v618_v29, %v2859_v25  ;;  %v3038_v53 = vpop.f32.mrb[61].mxu1  ;;  %1738 = vmatmul.mubr.f32.gmra.mrb[30].mxu0 %v3034_v52 }
 0x171   :  { %3392 = vst [vmem:[#allocation2_spill] sm:$0xff] %v3038_v53  ;;  %2115 = vpow2.f32 %v777_v5  ;;  %v728_v61 = vmul.f32 %v2100_v27, %v2096_v12  ;;  %v2102_v37 = vpop.eup %2101 }
 0x172   :  { %2117 = vtanh.f32 %v619_v32 }
 0x173   :  { %v3041_v41 = vpop.eup %2103  ;;  %v779_v19 = vmul.f32 1.442695, %v728_v61  ;;  %v624_v51 = vpop.f32.mrb[62].mxu1  ;;  %2119 = vtanh.f32 %v2815_v59 }
 0x174   :  { %v2106_v60 = vpop.eup %2105  ;;  %v625_v0 = vadd.f32 %v624_v51, %v2859_v25  ;;  %v3045_v62 = vpop.f32.mrb[63].mxu1  ;;  %1740 = vmatprep.mubr.f32.mxu0 %v3041_v41 }
 0x175   :  { %2121 = vpow2.f32 %v779_v19  ;;  %v729_v17 = vmul.f32 %v2106_v60, %v2102_v37  ;;  %v2108_v29 = vpop.eup %2107 }
 0x176   :  { %2123 = vtanh.f32 %v625_v0 }
 0x177   :  { %v3048_v12 = vpop.eup %2109  ;;  %v781_v5 = vmul.f32 1.442695, %v729_v17  ;;  %v630_v27 = vpop.f32.mrb[64].mxu1  ;;  %2125 = vtanh.f32 %v2830_v7 }
 0x178   :  { %v2112_v32 = vpop.eup %2111  ;;  %v631_v61 = vadd.f32 %v630_v27, %v2859_v25  ;;  %v3052_v59 = vpop.f32.mrb[65].mxu1  ;;  %1741 = vmatmul.mubr.f32.gmra.mrb[32].mxu0 %v3048_v12 }
 0x179   :  { %3393 = vst [vmem:[#allocation3_spill] sm:$0xff] %v3052_v59  ;;  %2127 = vpow2.f32 %v781_v5  ;;  %v730_v51 = vmul.f32 %v2112_v32, %v2108_v29  ;;  %v2114_v53 = vpop.eup %2113 }
 0x17a   :  { %2129 = vtanh.f32 %v631_v61 }
 0x17b   :  { %v3055_v37 = vpop.eup %2115  ;;  %v783_v19 = vmul.f32 1.442695, %v730_v51  ;;  %v636_v60 = vpop.f32.mrb[66].mxu1  ;;  %2131 = vtanh.f32 %v2825_v3 }
 0x17c   :  { %v2118_v0 = vpop.eup %2117  ;;  %v637_v17 = vadd.f32 %v636_v60, %v2859_v25  ;;  %v3059_v7 = vpop.f32.mrb[67].mxu1  ;;  %1743 = vmatprep.mubr.f32.mxu0 %v3055_v37 }
 0x17d   :  { %3394 = vst [vmem:[#allocation4_spill] sm:$0xff] %v3059_v7  ;;  %2133 = vpow2.f32 %v783_v19  ;;  %v731_v27 = vmul.f32 %v2118_v0, %v2114_v53  ;;  %v2120_v59 = vpop.eup %2119 }
 0x17e   :  { %2135 = vtanh.f32 %v637_v17 }
 0x17f   :  { %v3062_v29 = vpop.eup %2121  ;;  %v785_v5 = vmul.f32 1.442695, %v731_v27  ;;  %v642_v32 = vpop.f32.mrb[68].mxu1  ;;  %2137 = vtanh.f32 %v2840_v13 }
 0x180   :  { %v2124_v61 = vpop.eup %2123  ;;  %v643_v51 = vadd.f32 %v642_v32, %v2859_v25  ;;  %v3066_v3 = vpop.f32.mrb[69].mxu1  ;;  %1744 = vmatmul.mubr.f32.gmra.mrb[34].mxu0 %v3062_v29 }
 0x181   :  { %3395 = vst [vmem:[#allocation5_spill] sm:$0xff] %v3066_v3  ;;  %2139 = vpow2.f32 %v785_v5  ;;  %v732_v60 = vmul.f32 %v2124_v61, %v2120_v59  ;;  %v2126_v7 = vpop.eup %2125 }
 0x182   :  { %2141 = vtanh.f32 %v643_v51 }
 0x183   :  { %v3069_v53 = vpop.eup %2127  ;;  %v787_v19 = vmul.f32 1.442695, %v732_v60  ;;  %v648_v0 = vpop.f32.mrb[70].mxu1  ;;  %2143 = vtanh.f32 %v2835_v10 }
 0x184   :  { %v2130_v17 = vpop.eup %2129  ;;  %v649_v27 = vadd.f32 %v648_v0, %v2859_v25  ;;  %v3073_v13 = vpop.f32.mrb[71].mxu1  ;;  %1746 = vmatprep.mubr.f32.mxu0 %v3069_v53 }
 0x185   :  { %3396 = vst [vmem:[#allocation6_spill] sm:$0xff] %v3073_v13  ;;  %2145 = vpow2.f32 %v787_v19  ;;  %v733_v32 = vmul.f32 %v2130_v17, %v2126_v7  ;;  %v2132_v3 = vpop.eup %2131  ;;  %v1150_v7 = vld [vmem:[%s3385_s6 + $0x40] sm:$0xff]  ;;  %v1151_v19 = vld [vmem:[%s3385_s6 + $0x48] sm:$0xff] }
 0x186   :  { %2147 = vtanh.f32 %v649_v27 }
 0x187   :  { %v3076_v59 = vpop.eup %2133  ;;  %v789_v5 = vmul.f32 1.442695, %v733_v32  ;;  %v654_v61 = vpop.f32.mrb[72].mxu1  ;;  %2149 = vtanh.f32 %v2851_v20  ;;  %v1956_v32 = vpack.c.bf16 %v1151_v19, %v1150_v7 }
 0x188   :  { %v2136_v51 = vpop.eup %2135  ;;  %v655_v60 = vadd.f32 %v654_v61, %v2859_v25  ;;  %v3080_v10 = vpop.f32.mrb[73].mxu1  ;;  %1747 = vmatmul.mubr.f32.gmra.mrb[36].mxu0 %v3076_v59 }
 0x189   :  { %3397 = vst [vmem:[#allocation7_spill] sm:$0xff] %v3080_v10  ;;  %2151 = vpow2.f32 %v789_v5  ;;  %v734_v0 = vmul.f32 %v2136_v51, %v2132_v3  ;;  %v2138_v13 = vpop.eup %2137  ;;  %1957 = vmatprep.subr.bf16.mxu0 %v1956_v32 }
 0x18a   :  { %2153 = vtanh.f32 %v655_v60  ;;  %1959 = vmatpush3.bf16.msra.mxu0 %v1956_v32 }
 0x18b   :  { %v3089_v17 = vpop.eup %2139  ;;  %v791_v20 = vmul.f32 1.442695, %v734_v0  ;;  %v660_v27 = vpop.f32.mrb[74].mxu1  ;;  %2155 = vtanh.f32 %v2845_v16  ;;  %v1152_v0 = vld [vmem:[%s3385_s6 + $0x50] sm:$0xff]  ;;  %v1153_v16 = vld [vmem:[%s3385_s6 + $0x58] sm:$0xff] }
 0x18c   :  { %v2142_v61 = vpop.eup %2141  ;;  %v661_v3 = vadd.f32 %v660_v27, %v2859_v25  ;;  %v3093_v5 = vpop.f32.mrb[75].mxu1  ;;  %1749 = vmatprep.mubr.f32.mxu0 %v3089_v17  ;;  %v1960_v10 = vpack.c.bf16 %v1153_v16, %v1152_v0 }
 0x18d   :  { %3398 = vst [vmem:[#allocation8_spill] sm:$0xff] %v3093_v5  ;;  %2157 = vpow2.f32 %v791_v20  ;;  %v735_v51 = vmul.f32 %v2142_v61, %v2138_v13  ;;  %v2144_v60 = vpop.eup %2143 }
 0x18e   :  { %2159 = vtanh.f32 %v661_v3  ;;  %1961 = vmatprep.subr.bf16.mxu0 %v1960_v10  ;;  %v1154_v3 = vld [vmem:[%s3385_s6 + $0x60] sm:$0xff] }
 0x18f   :  { %v3102_v7 = vpop.eup %2145  ;;  %v793_v19 = vmul.f32 1.442695, %v735_v51  ;;  %v666_v27 = vpop.f32.mrb[76].mxu1  ;;  %2161 = vtanh.f32 %v2865_v63  ;;  %1963 = vmatpush3.bf16.msra.mxu0 %v1960_v10  ;;  %v1155_v63 = vld [vmem:[%s3385_s6 + $0x68] sm:$0xff] }
 0x190   :  { %v2148_v5 = vpop.eup %2147  ;;  %v667_v13 = vadd.f32 %v666_v27, %v2859_v25  ;;  %v3106_v20 = vpop.f32.mrb[77].mxu1  ;;  %1750 = vmatmul.mubr.f32.gmra.mrb[38].mxu0 %v3102_v7  ;;  %v1964_v27 = vpack.c.bf16 %v1155_v63, %v1154_v3 }
 0x191   :  { %3399 = vst [vmem:[#allocation9_spill] sm:$0xff] %v3106_v20  ;;  %2163 = vpow2.f32 %v793_v19  ;;  %v736_v32 = vmul.f32 %v2148_v5, %v2144_v60  ;;  %v2150_v61 = vpop.eup %2149 }
 0x192   :  { %2165 = vtanh.f32 %v667_v13  ;;  %1965 = vmatprep.subr.bf16.mxu0 %v1964_v27  ;;  %v1156_v13 = vld [vmem:[%s3385_s6 + $0x70] sm:$0xff] }
 0x193   :  { %v3115_v51 = vpop.eup %2151  ;;  %v795_v0 = vmul.f32 1.442695, %v736_v32  ;;  %v672_v16 = vpop.f32.mrb[78].mxu1  ;;  %2167 = vtanh.f32 %v2856_v23  ;;  %1967 = vmatpush3.bf16.msra.mxu0 %v1964_v27  ;;  %v1157_v23 = vld [vmem:[%s3385_s6 + $0x78] sm:$0xff] }
 0x194   :  { %3400 = vst [vmem:[#allocation10_spill] sm:$0xff] %v3115_v51  ;;  %v2154_v20 = vpop.eup %2153  ;;  %v673_v5 = vadd.f32 %v672_v16, %v2859_v25  ;;  %v3119_v60 = vpop.f32.mrb[79].mxu1  ;;  %1752 = vmatprep.mubr.f32.mxu0 %v3115_v51  ;;  %v1968_v3 = vpack.c.bf16 %v1157_v23, %v1156_v13 }
 0x195   :  { %3401 = vst [vmem:[#allocation11_spill] sm:$0xff] %v3119_v60  ;;  %2169 = vpow2.f32 %v795_v0  ;;  %v737_v10 = vmul.f32 %v2154_v20, %v2150_v61  ;;  %v2156_v19 = vpop.eup %2155 }
 0x196   :  { %2171 = vtanh.f32 %v673_v5  ;;  %1969 = vmatprep.subr.bf16.mxu0 %v1968_v3 }
 0x197   :  { %v3128_v32 = vpop.eup %2157  ;;  %v797_v25 = vmul.f32 1.442695, %v737_v10  ;;  %1971 = vmatpush3.bf16.msra.mxu0 %v1968_v3 }
 0x198   :  { %v2160_v63 = vpop.eup %2159  ;;  %1753 = vmatmul.mubr.f32.gmra.mrb[40].mxu0 %v3128_v32 }
 0x199   :  { %2173 = vpow2.f32 %v797_v25  ;;  %v738_v20 = vmul.f32 %v2160_v63, %v2156_v19  ;;  %v2162_v61 = vpop.eup %2161 }
 0x19b   :  { %v3131_v0 = vpop.eup %2163  ;;  %v799_v16 = vmul.f32 1.442695, %v738_v20 }
 0x19c   :  { %v2166_v27 = vpop.eup %2165  ;;  %1755 = vmatprep.mubr.f32.mxu0 %v3131_v0 }
 0x19d   :  { %2175 = vpow2.f32 %v799_v16  ;;  %v739_v5 = vmul.f32 %v2166_v27, %v2162_v61  ;;  %v2168_v60 = vpop.eup %2167 }
 0x19f   :  { %v3134_v51 = vpop.eup %2169  ;;  %v801_v10 = vmul.f32 1.442695, %v739_v5 }
 0x1a0   :  { %v2172_v13 = vpop.eup %2171  ;;  %1756 = vmatmul.mubr.f32.gmra.mrb[42].mxu0 %v3134_v51 }
 0x1a1   :  { %2177 = vpow2.f32 %v801_v10  ;;  %v740_v19 = vmul.f32 %v2172_v13, %v2168_v60  ;;  %v495_v13 = vadd.f32 %v2872_v33, %v2703_v6  ;;  %v507_v33 = vadd.f32 %v2880_v48, %v2703_v6 }
 0x1a2   :  { %v519_v48 = vadd.f32 %v2889_v24, %v2703_v6  ;;  %v531_v24 = vadd.f32 %v2913_v57, %v2703_v6  ;;  %v543_v57 = vadd.f32 %v2941_v43, %v2703_v6  ;;  %v555_v43 = vadd.f32 %v2957_v26, %v2703_v6 }
 0x1a3   :  { %v3137_v23 = vpop.eup %2173  ;;  %v803_v25 = vmul.f32 1.442695, %v740_v19  ;;  %v567_v26 = vadd.f32 %v2973_v15, %v2703_v6  ;;  %v579_v15 = vadd.f32 %v2989_v38, %v2703_v6  ;;  %v591_v38 = vadd.f32 %v3003_v45, %v2703_v6 }
 0x1a4   :  { %3402 = vst [vmem:[#allocation12_spill] sm:$0xff] %v3137_v23  ;;  %1758 = vmatprep.mubr.f32.mxu0 %v3137_v23  ;;  %v603_v45 = vadd.f32 %v3017_v50, %v2703_v6  ;;  %v615_v50 = vadd.f32 %v3031_v56, %v2703_v6  ;;  %v627_v56 = vadd.f32 %v3045_v62, %v2703_v6 }
 0x1a5   :  { %2179 = vpow2.f32 %v803_v25  ;;  %v489_v25 = vadd.f32 %v2869_v31, %v2703_v6  ;;  %v501_v31 = vadd.f32 %v2877_v39, %v2703_v6  ;;  %v513_v39 = vadd.f32 %v2886_v8, %v2703_v6 }
 0x1a6   :  { %v525_v8 = vadd.f32 %v2896_v35, %v2703_v6  ;;  %v537_v35 = vadd.f32 %v2929_v28, %v2703_v6  ;;  %v549_v28 = vadd.f32 %v2951_v55, %v2703_v6  ;;  %v561_v55 = vadd.f32 %v2967_v58, %v2703_v6 }
 0x1a7   :  { %v3140_v3 = vpop.eup %2175  ;;  %v573_v58 = vadd.f32 %v2983_v30, %v2703_v6  ;;  %v585_v30 = vadd.f32 %v2996_v4, %v2703_v6  ;;  %v597_v4 = vadd.f32 %v3010_v42, %v2703_v6  ;;  %v609_v42 = vadd.f32 %v3024_v47, %v2703_v6 }
 0x1a8   :  { %1759 = vmatmul.mubr.f32.gmra.mrb[44].mxu0 %v3140_v3 }
 0x1ab   :  { %v3143_v63 = vpop.eup %2177 }
 0x1ac   :  { %3403 = vst [vmem:[#allocation13_spill] sm:$0xff] %v3143_v63  ;;  %1761 = vmatprep.mubr.f32.mxu0 %v3143_v63 }
 0x1af   :  { %v3146_v20 = vpop.eup %2179 }
 0x1b0   :  { %3404 = vst [vmem:[#allocation14_spill] sm:$0xff] %v3146_v20  ;;  %1762 = vmatmul.mubr.f32.gmra.mrb[46].mxu0 %v3146_v20 }
 0x20b   :  { %v1718_v61 = vpop.f32.mrb[16].mxu0 }
 0x20c   :  { %2181 = vrcp.f32 %v1718_v61  ;;  %v887_v60 = vpop.f32.mrb[17].mxu0 }
 0x20d   :  { %2183 = vrcp.f32 %v887_v60 }
 0x213   :  { %v1721_v16 = vpop.f32.mrb[18].mxu0 }
 0x214   :  { %2185 = vrcp.f32 %v1721_v16  ;;  %v897_v27 = vpop.f32.mrb[19].mxu0 }
 0x215   :  { %2187 = vrcp.f32 %v897_v27 }
 0x216   :  { %v2182_v5 = vpop.eup %2181 }
 0x217   :  { %v2184_v10 = vpop.eup %2183  ;;  %v1079_v19 = vmul.f32 %v2182_v5, %v2918_v14 }
 0x218   :  { %v1078_v63 = vmul.f32 %v2184_v10, %v2904_v44 }
 0x219   :  { %v1111_v20 = vmul.f32 %v1079_v19, %v495_v13 }
 0x21a   :  { %v1110_v61 = vmul.f32 %v1078_v63, %v489_v25 }
 0x21b   :  { %v1724_v23 = vpop.f32.mrb[20].mxu0 }
 0x21c   :  { %2189 = vrcp.f32 %v1724_v23  ;;  %v907_v60 = vpop.f32.mrb[21].mxu0  ;;  %1796 = vmatprep.mubr.f32.mxu0 %v1110_v61 }
 0x21d   :  { %2191 = vrcp.f32 %v907_v60  ;;  %1797 = vmatmul.mubr.f32.vlgmr.msra.gmra.mrb[48].mxu0 %v1111_v20 }
 0x21e   :  { %v2186_v16 = vpop.eup %2185 }
 0x21f   :  { %v2188_v27 = vpop.eup %2187  ;;  %v1081_v14 = vmul.f32 %v2186_v16, %v2946_v54 }
 0x220   :  { %v1080_v44 = vmul.f32 %v2188_v27, %v2932_v1 }
 0x221   :  { %v1113_v5 = vmul.f32 %v1081_v14, %v507_v33 }
 0x222   :  { %v1112_v63 = vmul.f32 %v1080_v44, %v501_v31 }
 0x223   :  { %v1727_v10 = vpop.f32.mrb[22].mxu0 }
 0x224   :  { %2193 = vrcp.f32 %v1727_v10  ;;  %v917_v23 = vpop.f32.mrb[23].mxu0  ;;  %1799 = vmatprep.mubr.f32.mxu0 %v1112_v63 }
 0x225   :  { %2195 = vrcp.f32 %v917_v23  ;;  %1800 = vmatmul.mubr.f32.gmra.mrb[50].mxu0 %v1113_v5 }
 0x226   :  { %v2190_v20 = vpop.eup %2189 }
 0x227   :  { %v2192_v13 = vpop.eup %2191  ;;  %v1083_v54 = vmul.f32 %v2190_v20, %v2962_v34 }
 0x228   :  { %v1082_v1 = vmul.f32 %v2192_v13, %v2954_v18 }
 0x229   :  { %v1115_v19 = vmul.f32 %v1083_v54, %v519_v48 }
 0x22a   :  { %v1114_v25 = vmul.f32 %v1082_v1, %v513_v39 }
 0x22b   :  { %v1730_v61 = vpop.f32.mrb[24].mxu0 }
 0x22c   :  { %2197 = vrcp.f32 %v1730_v61  ;;  %v927_v60 = vpop.f32.mrb[25].mxu0  ;;  %1802 = vmatprep.mubr.f32.mxu0 %v1114_v25 }
 0x22d   :  { %2199 = vrcp.f32 %v927_v60  ;;  %1803 = vmatmul.mubr.f32.gmra.mrb[52].mxu0 %v1115_v19 }
 0x22e   :  { %v2194_v16 = vpop.eup %2193 }
 0x22f   :  { %v2196_v27 = vpop.eup %2195  ;;  %v1085_v34 = vmul.f32 %v2194_v16, %v2978_v11 }
 0x230   :  { %v1084_v18 = vmul.f32 %v2196_v27, %v2970_v49 }
 0x231   :  { %v1117_v33 = vmul.f32 %v1085_v34, %v531_v24 }
 0x232   :  { %v1116_v14 = vmul.f32 %v1084_v18, %v525_v8 }
 0x233   :  { %v1733_v31 = vpop.f32.mrb[26].mxu0 }
 0x234   :  { %2201 = vrcp.f32 %v1733_v31  ;;  %v937_v44 = vpop.f32.mrb[27].mxu0  ;;  %1805 = vmatprep.mubr.f32.mxu0 %v1116_v14 }
 0x235   :  { %2203 = vrcp.f32 %v937_v44  ;;  %1806 = vmatmul.mubr.f32.gmra.mrb[54].mxu0 %v1117_v33 }
 0x236   :  { %v2198_v5 = vpop.eup %2197 }
 0x237   :  { %v2200_v63 = vpop.eup %2199  ;;  %v1087_v11 = vmul.f32 %v2198_v5, %v2992_v40 }
 0x238   :  { %v1086_v49 = vmul.f32 %v2200_v63, %v2986_v36 }
 0x239   :  { %v1119_v10 = vmul.f32 %v1087_v11, %v543_v57 }
 0x23a   :  { %v1118_v23 = vmul.f32 %v1086_v49, %v537_v35 }
 0x23b   :  { %v1736_v20 = vpop.f32.mrb[28].mxu0 }
 0x23c   :  { %2205 = vrcp.f32 %v1736_v20  ;;  %v947_v13 = vpop.f32.mrb[29].mxu0  ;;  %1808 = vmatprep.mubr.f32.mxu0 %v1118_v23 }
 0x23d   :  { %2207 = vrcp.f32 %v947_v13  ;;  %1809 = vmatmul.mubr.f32.gmra.mrb[56].mxu0 %v1119_v10 }
 0x23e   :  { %v2202_v48 = vpop.eup %2201 }
 0x23f   :  { %v2204_v54 = vpop.eup %2203  ;;  %v1089_v40 = vmul.f32 %v2202_v48, %v3006_v2 }
 0x240   :  { %v1088_v36 = vmul.f32 %v2204_v54, %v2999_v21 }
 0x241   :  { %v1121_v39 = vmul.f32 %v1089_v40, %v555_v43 }
 0x242   :  { %v1120_v1 = vmul.f32 %v1088_v36, %v549_v28 }
 0x243   :  { %v1739_v19 = vpop.f32.mrb[30].mxu0 }
 0x244   :  { %2209 = vrcp.f32 %v1739_v19  ;;  %v957_v25 = vpop.f32.mrb[31].mxu0  ;;  %1811 = vmatprep.mubr.f32.mxu0 %v1120_v1 }
 0x245   :  { %2211 = vrcp.f32 %v957_v25  ;;  %1812 = vmatmul.mubr.f32.gmra.mrb[58].mxu0 %v1121_v39 }
 0x246   :  { %v2206_v61 = vpop.eup %2205 }
 0x247   :  { %v2208_v60 = vpop.eup %2207  ;;  %v1091_v2 = vmul.f32 %v2206_v61, %v3020_v9  ;;  %v3405_v61 = vld [vmem:[#allocation2_spill] sm:$0xff] }
 0x248   :  { %v1090_v21 = vmul.f32 %v2208_v60, %v3013_v46  ;;  %v621_v47 = vadd.f32 %v3405_v61, %v2703_v6 }
 0x249   :  { %v1123_v16 = vmul.f32 %v1091_v2, %v567_v26 }
 0x24a   :  { %v1122_v27 = vmul.f32 %v1090_v21, %v561_v55 }
 0x24b   :  { %v1742_v24 = vpop.f32.mrb[32].mxu0 }
 0x24c   :  { %2213 = vrcp.f32 %v1742_v24  ;;  %v967_v34 = vpop.f32.mrb[33].mxu0  ;;  %1814 = vmatprep.mubr.f32.mxu0 %v1122_v27  ;;  %v3406_v27 = vld [vmem:[#allocation4_spill] sm:$0xff]  ;;  %v3407_v24 = vld [vmem:[#allocation3_spill] sm:$0xff] }
 0x24d   :  { %2215 = vrcp.f32 %v967_v34  ;;  %1815 = vmatmul.mubr.f32.gmra.mrb[60].mxu0 %v1123_v16  ;;  %v639_v62 = vadd.f32 %v3406_v27, %v2703_v6  ;;  %v633_v34 = vadd.f32 %v3407_v24, %v2703_v6 }
 0x24e   :  { %v2210_v8 = vpop.eup %2209 }
 0x24f   :  { %v2212_v18 = vpop.eup %2211  ;;  %v1093_v9 = vmul.f32 %v2210_v8, %v3034_v52  ;;  %v3408_v8 = vld [vmem:[#allocation10_spill] sm:$0xff] }
 0x250   :  { %v1092_v46 = vmul.f32 %v2212_v18, %v3027_v22 }
 0x251   :  { %v1125_v33 = vmul.f32 %v1093_v9, %v579_v15 }
 0x252   :  { %v1124_v14 = vmul.f32 %v1092_v46, %v573_v58 }
 0x253   :  { %v1745_v31 = vpop.f32.mrb[34].mxu0 }
 0x254   :  { %2217 = vrcp.f32 %v1745_v31  ;;  %v977_v44 = vpop.f32.mrb[35].mxu0  ;;  %1817 = vmatprep.mubr.f32.mxu0 %v1124_v14  ;;  %v3409_v14 = vld [vmem:[#allocation6_spill] sm:$0xff] }
 0x255   :  { %2219 = vrcp.f32 %v977_v44  ;;  %1818 = vmatmul.mubr.f32.gmra.mrb[62].mxu0 %v1125_v33  ;;  %v651_v31 = vadd.f32 %v3409_v14, %v2703_v6  ;;  %v3410_v44 = vld [vmem:[#allocation5_spill] sm:$0xff] }
 0x256   :  { %v2214_v5 = vpop.eup %2213 }
 0x257   :  { %v2216_v63 = vpop.eup %2215  ;;  %v1095_v52 = vmul.f32 %v2214_v5, %v3048_v12  ;;  %v645_v5 = vadd.f32 %v3410_v44, %v2703_v6 }
 0x258   :  { %v1094_v22 = vmul.f32 %v2216_v63, %v3041_v41 }
 0x259   :  { %v1127_v57 = vmul.f32 %v1095_v52, %v591_v38 }
 0x25a   :  { %v1126_v11 = vmul.f32 %v1094_v22, %v585_v30 }
 0x25b   :  { %v1748_v35 = vpop.f32.mrb[36].mxu0 }
 0x25c   :  { %2221 = vrcp.f32 %v1748_v35  ;;  %v987_v49 = vpop.f32.mrb[37].mxu0  ;;  %1820 = vmatprep.mubr.f32.mxu0 %v1126_v11  ;;  %v3411_v35 = vld [vmem:[#allocation8_spill] sm:$0xff] }
 0x25d   :  { %2223 = vrcp.f32 %v987_v49  ;;  %1821 = vmatmul.mubr.f32.gmra.mrb[64].mxu0 %v1127_v57  ;;  %v663_v49 = vadd.f32 %v3411_v35, %v2703_v6 }
 0x25e   :  { %v2218_v10 = vpop.eup %2217 }
 0x25f   :  { %v2220_v23 = vpop.eup %2219  ;;  %v1097_v12 = vmul.f32 %v2218_v10, %v3062_v29  ;;  %v3412_v10 = vld [vmem:[#allocation7_spill] sm:$0xff] }
 0x260   :  { %v1096_v41 = vmul.f32 %v2220_v23, %v3055_v37  ;;  %v657_v23 = vadd.f32 %v3412_v10, %v2703_v6 }
 0x261   :  { %v1129_v20 = vmul.f32 %v1097_v12, %v603_v45  ;;  %v3413_v45 = vld [vmem:[#allocation12_spill] sm:$0xff] }
 0x262   :  { %v1128_v13 = vmul.f32 %v1096_v41, %v597_v4 }
 0x263   :  { %v1751_v48 = vpop.f32.mrb[38].mxu0 }
 0x264   :  { %2225 = vrcp.f32 %v1751_v48  ;;  %v997_v54 = vpop.f32.mrb[39].mxu0  ;;  %1823 = vmatprep.mubr.f32.mxu0 %v1128_v13  ;;  %v3414_v13 = vld [vmem:[#allocation11_spill] sm:$0xff] }
 0x265   :  { %2227 = vrcp.f32 %v997_v54  ;;  %1824 = vmatmul.mubr.f32.gmra.mrb[66].mxu0 %v1129_v20  ;;  %v675_v48 = vadd.f32 %v3414_v13, %v2703_v6  ;;  %v3415_v54 = vld [vmem:[#allocation14_spill] sm:$0xff] }
 0x266   :  { %v2222_v43 = vpop.eup %2221 }
 0x267   :  { %v2224_v40 = vpop.eup %2223  ;;  %v1099_v29 = vmul.f32 %v2222_v43, %v3076_v59 }
 0x268   :  { %v1098_v37 = vmul.f32 %v2224_v40, %v3069_v53  ;;  %v3416_v40 = vld [vmem:[#allocation9_spill] sm:$0xff] }
 0x269   :  { %v1131_v28 = vmul.f32 %v1099_v29, %v615_v50  ;;  %v669_v50 = vadd.f32 %v3416_v40, %v2703_v6 }
 0x26a   :  { %v1130_v36 = vmul.f32 %v1098_v37, %v609_v42 }
 0x26b   :  { %v1754_v39 = vpop.f32.mrb[40].mxu0 }
 0x26c   :  { %2229 = vrcp.f32 %v1754_v39  ;;  %v1007_v1 = vpop.f32.mrb[41].mxu0  ;;  %1826 = vmatprep.mubr.f32.mxu0 %v1130_v36 }
 0x26d   :  { %2231 = vrcp.f32 %v1007_v1  ;;  %1827 = vmatmul.mubr.f32.gmra.mrb[68].mxu0 %v1131_v28  ;;  %v3248_v28 = vld [vmem:[%s3386_s7] ss:$0 sm:$0xff] }
 0x26e   :  { %v2226_v19 = vpop.eup %2225 }
 0x26f   :  { %v2228_v25 = vpop.eup %2227  ;;  %v1101_v59 = vmul.f32 %v2226_v19, %v3102_v7 }
 0x270   :  { %v1100_v53 = vmul.f32 %v2228_v25, %v3089_v17 }
 0x271   :  { %v1133_v60 = vmul.f32 %v1101_v59, %v627_v56 }
 0x272   :  { %v1132_v26 = vmul.f32 %v1100_v53, %v621_v47 }
 0x273   :  { %v1757_v2 = vpop.f32.mrb[42].mxu0 }
 0x274   :  { %2233 = vrcp.f32 %v1757_v2  ;;  %v1017_v55 = vpop.f32.mrb[43].mxu0  ;;  %1829 = vmatprep.mubr.f32.mxu0 %v1132_v26 }
 0x275   :  { %2235 = vrcp.f32 %v1017_v55  ;;  %1830 = vmatmul.mubr.f32.gmra.mrb[70].mxu0 %v1133_v60 }
 0x276   :  { %v2230_v21 = vpop.eup %2229 }
 0x277   :  { %v2232_v16 = vpop.eup %2231  ;;  %v1103_v7 = vmul.f32 %v2230_v21, %v3128_v32 }
 0x278   :  { %v1102_v17 = vmul.f32 %v2232_v16, %v3408_v8 }
 0x279   :  { %v1135_v18 = vmul.f32 %v1103_v7, %v639_v62 }
 0x27a   :  { %v1134_v15 = vmul.f32 %v1102_v17, %v633_v34 }
 0x27b   :  { %v1760_v9 = vpop.f32.mrb[44].mxu0 }
 0x27c   :  { %2237 = vrcp.f32 %v1760_v9  ;;  %v1027_v58 = vpop.f32.mrb[45].mxu0  ;;  %1832 = vmatprep.mubr.f32.mxu0 %v1134_v15 }
 0x27d   :  { %2239 = vrcp.f32 %v1027_v58  ;;  %1833 = vmatmul.mubr.f32.gmra.mrb[72].mxu0 %v1135_v18 }
 0x27e   :  { %v2234_v46 = vpop.eup %2233 }
 0x27f   :  { %v2236_v33 = vpop.eup %2235  ;;  %v1105_v32 = vmul.f32 %v2234_v46, %v3134_v51 }
 0x280   :  { %v1104_v63 = vmul.f32 %v2236_v33, %v3131_v0 }
 0x281   :  { %v1137_v38 = vmul.f32 %v1105_v32, %v651_v31 }
 0x282   :  { %v1136_v52 = vmul.f32 %v1104_v63, %v645_v5 }
 0x283   :  { %v1763_v30 = vpop.f32.mrb[46].mxu0 }
 0x284   :  { %2241 = vrcp.f32 %v1763_v30  ;;  %v1037_v22 = vpop.f32.mrb[47].mxu0  ;;  %1835 = vmatprep.mubr.f32.mxu0 %v1136_v52 }
 0x285   :  { %2243 = vrcp.f32 %v1037_v22  ;;  %1836 = vmatmul.mubr.f32.gmra.mrb[74].mxu0 %v1137_v38 }
 0x286   :  { %v2238_v57 = vpop.eup %2237 }
 0x287   :  { %v2240_v11 = vpop.eup %2239  ;;  %v1107_v51 = vmul.f32 %v2238_v57, %v3140_v3  ;;  %v3417_v3 = vld [vmem:[#allocation13_spill] sm:$0xff] }
 0x288   :  { %v1106_v0 = vmul.f32 %v2240_v11, %v3413_v45 }
 0x289   :  { %v1139_v12 = vmul.f32 %v1107_v51, %v663_v49 }
 0x28a   :  { %v1138_v4 = vmul.f32 %v1106_v0, %v657_v23 }
 0x28c   :  { %1838 = vmatprep.mubr.f32.mxu0 %v1138_v4 }
 0x28d   :  { %1839 = vmatmul.mubr.f32.gmra.mrb[76].mxu0 %v1139_v12 }
 0x28e   :  { %v2242_v41 = vpop.eup %2241 }
 0x28f   :  { %v2244_v20 = vpop.eup %2243  ;;  %v1109_v43 = vmul.f32 %v2242_v41, %v3415_v54 }
 0x290   :  { %v1108_v29 = vmul.f32 %v2244_v20, %v3417_v3 }
 0x291   :  { %v1141_v42 = vmul.f32 %v1109_v43, %v675_v48 }
 0x292   :  { %v1140_v37 = vmul.f32 %v1108_v29, %v669_v50 }
 0x294   :  { %1841 = vmatprep.mubr.f32.mxu0 %v1140_v37 }
 0x295   :  { %1842 = vmatmul.mubr.f32.gmra.mrb[78].mxu0 %v1141_v42 }
 0x2f0   :  { %v1798_v36 = vpop.f32.mrb[48].mxu0 }
 0x2f1   :  { %v1237_v39 = vadd.f32 %v1798_v36, %v3248_v28  ;;  %v1231_v1 = vpop.f32.mrb[49].mxu0 }
 0x2f2   :  { %v1232_v19 = vadd.f32 %v3248_v28, %v1231_v1 }
 0x2f3   :  { %2245 = vtanh.f32 %v1237_v39 }
 0x2f4   :  { %2247 = vtanh.f32 %v1232_v19 }
 0x2f8   :  { %v1801_v6 = vpop.f32.mrb[50].mxu0 }
 0x2f9   :  { %v1247_v25 = vadd.f32 %v1801_v6, %v3248_v28  ;;  %v1241_v56 = vpop.f32.mrb[51].mxu0 }
 0x2fa   :  { %v1242_v59 = vadd.f32 %v3248_v28, %v1241_v56 }
 0x2fb   :  { %2249 = vtanh.f32 %v1247_v25 }
 0x2fc   :  { %2251 = vtanh.f32 %v1242_v59 }
 0x2fd   :  { %v2246_v61 = vpop.eup %2245 }
 0x2fe   :  { %v2248_v47 = vpop.eup %2247  ;;  %1423 = vst [vmem:[%s3387_s9 + $0x8] sm:$0xff] %v2246_v61 }
 0x2ff   :  { %1422 = vst [vmem:[%s3387_s9] sm:$0xff] %v2248_v47 }
 0x300   :  { %v1804_v53 = vpop.f32.mrb[52].mxu0 }
 0x301   :  { %v1257_v60 = vadd.f32 %v1804_v53, %v3248_v28  ;;  %v1251_v26 = vpop.f32.mrb[53].mxu0 }
 0x302   :  { %v1252_v2 = vadd.f32 %v3248_v28, %v1251_v26 }
 0x303   :  { %2253 = vtanh.f32 %v1257_v60 }
 0x304   :  { %2255 = vtanh.f32 %v1252_v2 }
 0x305   :  { %v2250_v55 = vpop.eup %2249 }
 0x306   :  { %v2252_v21 = vpop.eup %2251  ;;  %1425 = vst [vmem:[%s3387_s9 + $0x18] sm:$0xff] %v2250_v55 }
 0x307   :  { %1424 = vst [vmem:[%s3387_s9 + $0x10] sm:$0xff] %v2252_v21 }
 0x308   :  { %v1807_v16 = vpop.f32.mrb[54].mxu0 }
 0x309   :  { %v1267_v27 = vadd.f32 %v1807_v16, %v3248_v28  ;;  %v1261_v62 = vpop.f32.mrb[55].mxu0 }
 0x30a   :  { %v1262_v7 = vadd.f32 %v3248_v28, %v1261_v62 }
 0x30b   :  { %2257 = vtanh.f32 %v1267_v27 }
 0x30c   :  { %2259 = vtanh.f32 %v1262_v7 }
 0x30d   :  { %v2254_v24 = vpop.eup %2253 }
 0x30e   :  { %v2256_v34 = vpop.eup %2255  ;;  %1427 = vst [vmem:[%s3387_s9 + $0x28] sm:$0xff] %v2254_v24 }
 0x30f   :  { %1426 = vst [vmem:[%s3387_s9 + $0x20] sm:$0xff] %v2256_v34 }
 0x310   :  { %v1810_v8 = vpop.f32.mrb[56].mxu0 }
 0x311   :  { %v1277_v17 = vadd.f32 %v1810_v8, %v3248_v28  ;;  %v1271_v18 = vpop.f32.mrb[57].mxu0 }
 0x312   :  { %v1272_v15 = vadd.f32 %v3248_v28, %v1271_v18 }
 0x313   :  { %2261 = vtanh.f32 %v1277_v17 }
 0x314   :  { %2263 = vtanh.f32 %v1272_v15 }
 0x315   :  { %v2258_v9 = vpop.eup %2257 }
 0x316   :  { %v2260_v58 = vpop.eup %2259  ;;  %1429 = vst [vmem:[%s3387_s9 + $0x38] sm:$0xff] %v2258_v9 }
 0x317   :  { %1428 = vst [vmem:[%s3387_s9 + $0x30] sm:$0xff] %v2260_v58 }
 0x318   :  { %v1813_v46 = vpop.f32.mrb[58].mxu0 }
 0x319   :  { %v1287_v33 = vadd.f32 %v1813_v46, %v3248_v28  ;;  %v1281_v14 = vpop.f32.mrb[59].mxu0 }
 0x31a   :  { %v1282_v31 = vadd.f32 %v3248_v28, %v1281_v14 }
 0x31b   :  { %2265 = vtanh.f32 %v1287_v33 }
 0x31c   :  { %2267 = vtanh.f32 %v1282_v31 }
 0x31d   :  { %v2262_v32 = vpop.eup %2261 }
 0x31e   :  { %v2264_v44 = vpop.eup %2263  ;;  %1431 = vst [vmem:[%s3387_s9 + $0x48] sm:$0xff] %v2262_v32 }
 0x31f   :  { %1430 = vst [vmem:[%s3387_s9 + $0x40] sm:$0xff] %v2264_v44 }
 0x320   :  { %v1816_v5 = vpop.f32.mrb[60].mxu0 }
 0x321   :  { %v1297_v63 = vadd.f32 %v1816_v5, %v3248_v28  ;;  %v1291_v38 = vpop.f32.mrb[61].mxu0 }
 0x322   :  { %v1292_v52 = vadd.f32 %v3248_v28, %v1291_v38 }
 0x323   :  { %2269 = vtanh.f32 %v1297_v63 }
 0x324   :  { %2271 = vtanh.f32 %v1292_v52 }
 0x325   :  { %v2266_v30 = vpop.eup %2265 }
 0x326   :  { %v2268_v22 = vpop.eup %2267  ;;  %1433 = vst [vmem:[%s3387_s9 + $0x58] sm:$0xff] %v2266_v30 }
 0x327   :  { %1432 = vst [vmem:[%s3387_s9 + $0x50] sm:$0xff] %v2268_v22 }
 0x328   :  { %v1819_v57 = vpop.f32.mrb[62].mxu0 }
 0x329   :  { %v1307_v11 = vadd.f32 %v1819_v57, %v3248_v28  ;;  %v1301_v35 = vpop.f32.mrb[63].mxu0 }
 0x32a   :  { %v1302_v49 = vadd.f32 %v3248_v28, %v1301_v35 }
 0x32b   :  { %2273 = vtanh.f32 %v1307_v11 }
 0x32c   :  { %2275 = vtanh.f32 %v1302_v49 }
 0x32d   :  { %v2270_v51 = vpop.eup %2269 }
 0x32e   :  { %v2272_v10 = vpop.eup %2271  ;;  %1435 = vst [vmem:[%s3387_s9 + $0x68] sm:$0xff] %v2270_v51 }
 0x32f   :  { %1434 = vst [vmem:[%s3387_s9 + $0x60] sm:$0xff] %v2272_v10 }
 0x330   :  { %v1822_v23 = vpop.f32.mrb[64].mxu0 }
 0x331   :  { %v1317_v45 = vadd.f32 %v1822_v23, %v3248_v28  ;;  %v1311_v0 = vpop.f32.mrb[65].mxu0 }
 0x332   :  { %v1312_v12 = vadd.f32 %v3248_v28, %v1311_v0 }
 0x333   :  { %2277 = vtanh.f32 %v1317_v45 }
 0x334   :  { %2279 = vtanh.f32 %v1312_v12 }
 0x335   :  { %v2274_v4 = vpop.eup %2273 }
 0x336   :  { %v2276_v41 = vpop.eup %2275  ;;  %1437 = vst [vmem:[%s3387_s9 + $0x78] sm:$0xff] %v2274_v4 }
 0x337   :  { %1436 = vst [vmem:[%s3387_s9 + $0x70] sm:$0xff] %v2276_v41 }
 0x338   :  { %v1825_v20 = vpop.f32.mrb[66].mxu0 }
 0x339   :  { %v1327_v13 = vadd.f32 %v1825_v20, %v3248_v28  ;;  %v1321_v48 = vpop.f32.mrb[67].mxu0 }
 0x33a   :  { %v1322_v54 = vadd.f32 %v3248_v28, %v1321_v48 }
 0x33b   :  { %2281 = vtanh.f32 %v1327_v13 }
 0x33c   :  { %2283 = vtanh.f32 %v1322_v54 }
 0x33d   :  { %v2278_v43 = vpop.eup %2277 }
 0x33e   :  { %v2280_v40 = vpop.eup %2279  ;;  %1439 = vst [vmem:[%s3387_s9 + $0x88] sm:$0xff] %v2278_v43 }
 0x33f   :  { %1438 = vst [vmem:[%s3387_s9 + $0x80] sm:$0xff] %v2280_v40 }
 0x340   :  { %v1828_v50 = vpop.f32.mrb[68].mxu0 }
 0x341   :  { %v1337_v3 = vadd.f32 %v1828_v50, %v3248_v28  ;;  %v1331_v29 = vpop.f32.mrb[69].mxu0 }
 0x342   :  { %v1332_v42 = vadd.f32 %v3248_v28, %v1331_v29 }
 0x343   :  { %2285 = vtanh.f32 %v1337_v3 }
 0x344   :  { %2287 = vtanh.f32 %v1332_v42 }
 0x345   :  { %v2282_v37 = vpop.eup %2281 }
 0x346   :  { %v2284_v36 = vpop.eup %2283  ;;  %1441 = vst [vmem:[%s3387_s9 + $0x98] sm:$0xff] %v2282_v37 }
 0x347   :  { %1440 = vst [vmem:[%s3387_s9 + $0x90] sm:$0xff] %v2284_v36 }
 0x348   :  { %v1831_v39 = vpop.f32.mrb[70].mxu0 }
 0x349   :  { %v1347_v1 = vadd.f32 %v1831_v39, %v3248_v28  ;;  %v1341_v19 = vpop.f32.mrb[71].mxu0 }
 0x34a   :  { %v1342_v6 = vadd.f32 %v3248_v28, %v1341_v19 }
 0x34b   :  { %2289 = vtanh.f32 %v1347_v1 }
 0x34c   :  { %2291 = vtanh.f32 %v1342_v6 }
 0x34d   :  { %v2286_v25 = vpop.eup %2285 }
 0x34e   :  { %v2288_v56 = vpop.eup %2287  ;;  %1443 = vst [vmem:[%s3387_s9 + $0xa8] sm:$0xff] %v2286_v25 }
 0x34f   :  { %1442 = vst [vmem:[%s3387_s9 + $0xa0] sm:$0xff] %v2288_v56 }
 0x350   :  { %v1834_v59 = vpop.f32.mrb[72].mxu0 }
 0x351   :  { %v1357_v61 = vadd.f32 %v1834_v59, %v3248_v28  ;;  %v1351_v47 = vpop.f32.mrb[73].mxu0 }
 0x352   :  { %v1352_v53 = vadd.f32 %v3248_v28, %v1351_v47 }
 0x353   :  { %2293 = vtanh.f32 %v1357_v61 }
 0x354   :  { %2295 = vtanh.f32 %v1352_v53 }
 0x355   :  { %v2290_v60 = vpop.eup %2289 }
 0x356   :  { %v2292_v26 = vpop.eup %2291  ;;  %1445 = vst [vmem:[%s3387_s9 + $0xb8] sm:$0xff] %v2290_v60 }
 0x357   :  { %1444 = vst [vmem:[%s3387_s9 + $0xb0] sm:$0xff] %v2292_v26 }
 0x358   :  { %v1837_v2 = vpop.f32.mrb[74].mxu0 }
 0x359   :  { %v1367_v55 = vadd.f32 %v1837_v2, %v3248_v28  ;;  %v1361_v21 = vpop.f32.mrb[75].mxu0 }
 0x35a   :  { %v1362_v16 = vadd.f32 %v3248_v28, %v1361_v21 }
 0x35b   :  { %2297 = vtanh.f32 %v1367_v55 }
 0x35c   :  { %2299 = vtanh.f32 %v1362_v16 }
 0x35d   :  { %v2294_v27 = vpop.eup %2293 }
 0x35e   :  { %v2296_v62 = vpop.eup %2295  ;;  %1447 = vst [vmem:[%s3387_s9 + $0xc8] sm:$0xff] %v2294_v27 }
 0x35f   :  { %1446 = vst [vmem:[%s3387_s9 + $0xc0] sm:$0xff] %v2296_v62 }
 0x360   :  { %v1840_v7 = vpop.f32.mrb[76].mxu0 }
 0x361   :  { %v1377_v24 = vadd.f32 %v1840_v7, %v3248_v28  ;;  %v1371_v34 = vpop.f32.mrb[77].mxu0 }
 0x362   :  { %v1372_v8 = vadd.f32 %v3248_v28, %v1371_v34 }
 0x363   :  { %2301 = vtanh.f32 %v1377_v24 }
 0x364   :  { %2303 = vtanh.f32 %v1372_v8 }
 0x365   :  { %v2298_v17 = vpop.eup %2297 }
 0x366   :  { %v2300_v18 = vpop.eup %2299  ;;  %1449 = vst [vmem:[%s3387_s9 + $0xd8] sm:$0xff] %v2298_v17 }
 0x367   :  { %1448 = vst [vmem:[%s3387_s9 + $0xd0] sm:$0xff] %v2300_v18 }
 0x368   :  { %v1843_v15 = vpop.f32.mrb[78].mxu0 }
 0x369   :  { %v1387_v9 = vadd.f32 %v1843_v15, %v3248_v28  ;;  %v1381_v58 = vpop.f32.mrb[79].mxu0 }
 0x36a   :  { %v1382_v46 = vadd.f32 %v3248_v28, %v1381_v58 }
 0x36b   :  { %2305 = vtanh.f32 %v1387_v9 }
 0x36c   :  { %2307 = vtanh.f32 %v1382_v46 }
 0x36d   :  { %v2302_v33 = vpop.eup %2301 }
 0x36e   :  { %v2304_v14 = vpop.eup %2303  ;;  %1451 = vst [vmem:[%s3387_s9 + $0xe8] sm:$0xff] %v2302_v33 }
 0x36f   :  { %1450 = vst [vmem:[%s3387_s9 + $0xe0] sm:$0xff] %v2304_v14 }
 0x375   :  { %v2306_v31 = vpop.eup %2305 }
 0x376   :  { %v2308_v32 = vpop.eup %2307  ;;  %1453 = vst [vmem:[%s3387_s9 + $0xf8] sm:$0xff] %v2306_v31 }
 0x377   :  { %1452 = vst [vmem:[%s3387_s9 + $0xf0] sm:$0xff] %v2308_v32 }

</bundles_post_ra>
